<compile_context>
chip_gen: v7x
topology: tpu7x:2x2x1
jax: 0.10.0
libtpu: 0.0.40
codegen_flags: <defaults>
</compile_context>

<pallas_src>
import numpy as np
import jax
import jax.numpy as jnp
from jax.experimental import pallas as pl
from jax.experimental.pallas import tpu as pltpu

HIDDEN = 512
LEAKY_SLOPE = 0.2
TILE_B_MAX = 256   # safe on all generations; could be raised to 512-1024 on v6e (128 MiB VMEM)


def _round_up(x, m):
    return (x + m - 1) // m * m


def _leaky_relu(x, slope):
    return jnp.where(x > 0, x, slope * x)


def _disc_kernel(ximg_ref, lab_ref, w1_ref, w2_ref, b2_ref, w3_ref, b3_ref, out_ref):
    # Layer 1: bf16 cast happens in-kernel (VPU work that hides under the MXU matmul).
    x = ximg_ref[...].astype(jnp.bfloat16)
    h1 = jnp.dot(x, w1_ref[...], preferred_element_type=jnp.float32)
    h1 = h1 + lab_ref[...].astype(jnp.float32)     # label-embedding term with b1 folded in
    h1 = _leaky_relu(h1, LEAKY_SLOPE).astype(jnp.bfloat16)

    # Layer 2: Linear(512, 512) + Dropout(0.4) + LeakyReLU(0.2).
    # TODO(synk): Dropout(0.4) is treated as identity (eval-mode semantics); training-mode
    # parity would need an in-kernel PRNG mask (pltpu.prng_seed / prng_random_bits).
    h2 = jnp.dot(h1, w2_ref[...], preferred_element_type=jnp.float32) + b2_ref[...]
    h2 = _leaky_relu(h2, LEAKY_SLOPE).astype(jnp.bfloat16)

    # Layer 3: Linear(512, 512), f32 output (bf16 output would halve writeback if the
    # downstream softmax-GAN loss tolerates it).
    out_ref[...] = (
        jnp.dot(h2, w3_ref[...], preferred_element_type=jnp.float32) + b3_ref[...]
    )


def prepare_params(params, shape):
    """One-time preprocessing: split W1, cast weights to bf16, reshape biases."""
    d_img = int(np.prod(shape))
    w1 = params["w1"]                                   # (d_img + num_classes, 512)
    return {
        "emb": params["emb"],                           # (num_classes, num_classes) f32
        "w1_img": w1[:d_img].astype(jnp.bfloat16),      # (d_img, 512) bf16, VMEM-resident
        "w1_lab": w1[d_img:],                           # (num_classes, 512) f32 (tiny)
        "b1": params["b1"].reshape(1, HIDDEN).astype(jnp.float32),
        "w2": params["w2"].astype(jnp.bfloat16),
        "b2": params["b2"].reshape(1, HIDDEN).astype(jnp.float32),
        "w3": params["w3"].astype(jnp.bfloat16),
        "b3": params["b3"].reshape(1, HIDDEN).astype(jnp.float32),
        "d_img": d_img,
    }


def discriminator_forward(img, labels, prep):
    """img: (B, C, H, W) float32 (NCHW), labels: (B,) int32, prep: prepare_params()."""
    B = img.shape[0]
    d_img = prep["d_img"]

    # Batch tile: multiple of 16 (bf16 sublane packing). Once B > 16, split into at
    # least two grid steps so the "parallel" batch axis shards across both v7x TCs.
    if B <= 16:
        tile_b = _round_up(max(B, 1), 16)
    else:
        tile_b = min(_round_up(pl.cdiv(B, 2), 16), TILE_B_MAX)
    b_pad = _round_up(B, tile_b)
    grid = (b_pad // tile_b,)

    # img enters the kernel as f32; the bf16 cast is done inside the kernel so there
    # is no standalone cast/pad pass over the image in HBM.
    img_flat = img.reshape(B, d_img)
    # Label-embedding contribution of layer 1 (B x num_classes x 512 — negligible),
    # with b1 folded in; bf16 halves its per-tile HBM traffic.
    lab_term = (
        jnp.take(prep["emb"], labels, axis=0) @ prep["w1_lab"] + prep["b1"]
    ).astype(jnp.bfloat16)
    if b_pad != B:
        img_flat = jnp.pad(img_flat, ((0, b_pad - B), (0, 0)))
        lab_term = jnp.pad(lab_term, ((0, b_pad - B), (0, 0)))

    # VMEM sizing: single-buffered resident weights + double-buffered streamed tiles,
    # clamped comfortably under physical per-core VMEM (v7x only has 64 MiB).
    resident = (d_img * HIDDEN + 2 * HIDDEN * HIDDEN) * 2 + 2 * HIDDEN * 4
    per_tile = tile_b * (d_img * 4 + HIDDEN * 2 + HIDDEN * 4)
    try:
        phys_vmem = int(pltpu.get_tpu_info().vmem_capacity_bytes)
        vmem_cap = (phys_vmem * 3) // 4          # headroom for Mosaic internal scratch
    except Exception:
        vmem_cap = 48 * 2**20                    # conservative, v7x-safe fallback
    vmem_limit = int(
        min(max(resident + 2 * per_tile + (2 << 20), 16 * 2**20), vmem_cap)
    )

    flops = 2 * b_pad * HIDDEN * (d_img + 2 * HIDDEN)
    bytes_accessed = b_pad * (d_img * 4 + HIDDEN * 2 + HIDDEN * 4) + resident

    # Constant-index (resident) operands: single-buffered — no point double-buffering
    # blocks whose index_map never changes.
    def const_spec(shape):
        return pl.BlockSpec(shape, lambda i: (0, 0), pipeline_mode=pl.Buffered(1))

    out_p = pl.pallas_call(
        _disc_kernel,
        out_shape=jax.ShapeDtypeStruct((b_pad, HIDDEN), jnp.float32),
        grid=grid,
        in_specs=[
            pl.BlockSpec((tile_b, d_img), lambda i: (i, 0)),   # img tile (f32, cast in-kernel)
            pl.BlockSpec((tile_b, HIDDEN), lambda i: (i, 0)),  # label term (+b1), bf16
            const_spec((d_img, HIDDEN)),                       # W1_img (resident)
            const_spec((HIDDEN, HIDDEN)),                      # W2 (resident)
            const_spec((1, HIDDEN)),                           # b2
            const_spec((HIDDEN, HIDDEN)),                      # W3 (resident)
            const_spec((1, HIDDEN)),                           # b3
        ],
        out_specs=pl.BlockSpec((tile_b, HIDDEN), lambda i: (i, 0)),
        compiler_params=pltpu.CompilerParams(
            dimension_semantics=("parallel",),
            vmem_limit_bytes=vmem_limit,
        ),
        cost_estimate=pl.CostEstimate(
            flops=flops, transcendentals=0, bytes_accessed=bytes_accessed
        ),
    )(
        img_flat,
        lab_term,
        prep["w1_img"],
        prep["w2"],
        prep["b2"],
        prep["w3"],
        prep["b3"],
    )
    return out_p[:B]


def init_params(key, num_classes, shape):
    d_in = num_classes + int(np.prod(shape))
    ks = jax.random.split(key, 7)

    def uni(k, shp, fan_in):
        bound = 1.0 / np.sqrt(fan_in)
        return jax.random.uniform(k, shp, jnp.float32, -bound, bound)

    return {
        "emb": jax.random.normal(ks[0], (num_classes, num_classes), jnp.float32),
        "w1": uni(ks[1], (d_in, HIDDEN), d_in),
        "b1": uni(ks[2], (HIDDEN,), d_in),
        "w2": uni(ks[3], (HIDDEN, HIDDEN), HIDDEN),
        "b2": uni(ks[4], (HIDDEN,), HIDDEN),
        "w3": uni(ks[5], (HIDDEN, HIDDEN), HIDDEN),
        "b3": uni(ks[6], (HIDDEN,), HIDDEN),
    }


def reference_forward(img, labels, params):
    B = img.shape[0]
    x = jnp.concatenate(
        [img.reshape(B, -1), jnp.take(params["emb"], labels, axis=0)], axis=-1
    )
    h1 = _leaky_relu(x @ params["w1"] + params["b1"], LEAKY_SLOPE)
    h2 = _leaky_relu(h1 @ params["w2"] + params["b2"], LEAKY_SLOPE)
    return h2 @ params["w3"] + params["b3"]


if __name__ == "__main__":
    num_classes = 10
    shape = (1, 16, 16)          # image shape (C, H, W)
    B = 2

    key = jax.random.PRNGKey(0)
    k_img, k_lab, k_par = jax.random.split(key, 3)

    img = jax.random.normal(k_img, (B,) + shape, jnp.float32)
    labels = jax.random.randint(k_lab, (B,), 0, num_classes, jnp.int32)
    params = init_params(k_par, num_classes, shape)
    prep = prepare_params(params, shape)

    out = discriminator_forward(img, labels, prep)
    out = jax.block_until_ready(out)

    ref = reference_forward(img, labels, params)
    assert out.shape == (B, HIDDEN)
    # bf16 matmuls / bf16 label term with f32 accumulation vs. pure-f32 reference:
    # loose tolerance (documented ~1e-2-level divergence from the PyTorch f32 logits).
    np.testing.assert_allclose(np.asarray(out), np.asarray(ref), rtol=3e-2, atol=3e-2)
    print("KERNEL_OK")
</pallas_src>

<mosaic_0001>
module attributes {stable_mosaic.version = 11 : i64} {
  func.func @_disc_kernel(%arg0: i32, %arg1: memref<16x256xf32, #tpu.memory_space<vmem>>, %arg2: memref<16x512xbf16, #tpu.memory_space<vmem>>, %arg3: memref<256x512xbf16, #tpu.memory_space<vmem>>, %arg4: memref<512x512xbf16, #tpu.memory_space<vmem>>, %arg5: memref<1x512xf32, #tpu.memory_space<vmem>>, %arg6: memref<512x512xbf16, #tpu.memory_space<vmem>>, %arg7: memref<1x512xf32, #tpu.memory_space<vmem>>, %arg8: memref<16x512xf32, #tpu.memory_space<vmem>>) attributes {dimension_semantics = [#tpu.dimension_semantics<parallel>], iteration_bounds = array<i64: 1>, scalar_prefetch = 0 : i64, scratch_operands = 0 : i64, tpu.core_type = #tpu.core_type<tc>, window_params = [{transform_indices = @transform_0, window_bounds = array<i64: 16, 256>}, {transform_indices = @transform_1, window_bounds = array<i64: 16, 512>}, {pipeline_mode = #tpu.pipeline_mode<synchronous>, transform_indices = @transform_2, window_bounds = array<i64: 256, 512>}, {pipeline_mode = #tpu.pipeline_mode<synchronous>, transform_indices = @transform_3, window_bounds = array<i64: 512, 512>}, {pipeline_mode = #tpu.pipeline_mode<synchronous>, transform_indices = @transform_4, window_bounds = array<i64: 1, 512>}, {pipeline_mode = #tpu.pipeline_mode<synchronous>, transform_indices = @transform_5, window_bounds = array<i64: 512, 512>}, {pipeline_mode = #tpu.pipeline_mode<synchronous>, transform_indices = @transform_6, window_bounds = array<i64: 1, 512>}, {transform_indices = @transform_7, window_bounds = array<i64: 16, 512>}]} {
    %c0 = arith.constant 0 : index
    %c0_0 = arith.constant 0 : index
    %0 = vector.load %arg1[%c0, %c0_0] : memref<16x256xf32, #tpu.memory_space<vmem>>, vector<16x256xf32>
    %1 = arith.truncf %0 : vector<16x256xf32> to vector<16x256xbf16>
    %c0_1 = arith.constant 0 : index
    %c0_2 = arith.constant 0 : index
    %2 = vector.load %arg3[%c0_1, %c0_2] : memref<256x512xbf16, #tpu.memory_space<vmem>>, vector<256x512xbf16>
    %cst = arith.constant dense<0.000000e+00> : vector<16x512xf32>
    %3 = tpu.matmul %1, %2, %cst {dimension_numbers = #tpu.dot_dimension_numbers<[1], [0], [0], [1], [0, 0, 1, 1], [], []>} : vector<16x256xbf16>, vector<256x512xbf16>, vector<16x512xf32> -> vector<16x512xf32>
    %c0_3 = arith.constant 0 : index
    %c0_4 = arith.constant 0 : index
    %4 = vector.load %arg2[%c0_3, %c0_4] : memref<16x512xbf16, #tpu.memory_space<vmem>>, vector<16x512xbf16>
    %5 = arith.extf %4 : vector<16x512xbf16> to vector<16x512xf32>
    %6 = arith.addf %3, %5 : vector<16x512xf32>
    %cst_5 = arith.constant 0.000000e+00 : f32
    %7 = vector.broadcast %cst_5 : f32 to vector<16x512xf32>
    %8 = arith.cmpf ogt, %6, %7 : vector<16x512xf32>
    %cst_6 = arith.constant 2.000000e-01 : f32
    %9 = vector.broadcast %cst_6 : f32 to vector<16x512xf32>
    %10 = arith.mulf %9, %6 : vector<16x512xf32>
    %11 = arith.select %8, %6, %10 : vector<16x512xi1>, vector<16x512xf32>
    %12 = arith.truncf %11 : vector<16x512xf32> to vector<16x512xbf16>
    %c0_7 = arith.constant 0 : index
    %c0_8 = arith.constant 0 : index
    %13 = vector.load %arg4[%c0_7, %c0_8] : memref<512x512xbf16, #tpu.memory_space<vmem>>, vector<512x512xbf16>
    %cst_9 = arith.constant dense<0.000000e+00> : vector<16x512xf32>
    %14 = tpu.matmul %12, %13, %cst_9 {dimension_numbers = #tpu.dot_dimension_numbers<[1], [0], [0], [1], [0, 0, 1, 1], [], []>} : vector<16x512xbf16>, vector<512x512xbf16>, vector<16x512xf32> -> vector<16x512xf32>
    %c0_10 = arith.constant 0 : index
    %c0_11 = arith.constant 0 : index
    %15 = vector.load %arg5[%c0_10, %c0_11] : memref<1x512xf32, #tpu.memory_space<vmem>>, vector<1x512xf32>
    %16 = vector.broadcast %15 : vector<1x512xf32> to vector<16x512xf32>
    %17 = arith.addf %14, %16 : vector<16x512xf32>
    %cst_12 = arith.constant 0.000000e+00 : f32
    %18 = vector.broadcast %cst_12 : f32 to vector<16x512xf32>
    %19 = arith.cmpf ogt, %17, %18 : vector<16x512xf32>
    %cst_13 = arith.constant 2.000000e-01 : f32
    %20 = vector.broadcast %cst_13 : f32 to vector<16x512xf32>
    %21 = arith.mulf %20, %17 : vector<16x512xf32>
    %22 = arith.select %19, %17, %21 : vector<16x512xi1>, vector<16x512xf32>
    %23 = arith.truncf %22 : vector<16x512xf32> to vector<16x512xbf16>
    %c0_14 = arith.constant 0 : index
    %c0_15 = arith.constant 0 : index
    %24 = vector.load %arg6[%c0_14, %c0_15] : memref<512x512xbf16, #tpu.memory_space<vmem>>, vector<512x512xbf16>
    %cst_16 = arith.constant dense<0.000000e+00> : vector<16x512xf32>
    %25 = tpu.matmul %23, %24, %cst_16 {dimension_numbers = #tpu.dot_dimension_numbers<[1], [0], [0], [1], [0, 0, 1, 1], [], []>} : vector<16x512xbf16>, vector<512x512xbf16>, vector<16x512xf32> -> vector<16x512xf32>
    %c0_17 = arith.constant 0 : index
    %c0_18 = arith.constant 0 : index
    %26 = vector.load %arg7[%c0_17, %c0_18] : memref<1x512xf32, #tpu.memory_space<vmem>>, vector<1x512xf32>
    %27 = vector.broadcast %26 : vector<1x512xf32> to vector<16x512xf32>
    %28 = arith.addf %25, %27 : vector<16x512xf32>
    %c0_19 = arith.constant 0 : index
    %c0_20 = arith.constant 0 : index
    %29 = vector.load %arg8[%c0_19, %c0_20] : memref<16x512xf32, #tpu.memory_space<vmem>>, vector<16x512xf32>
    tpu.vector_store %arg8[%c0_19, %c0_20], %28 {strides = array<i32>} : memref<16x512xf32, #tpu.memory_space<vmem>>, vector<16x512xf32>,
    return
  }
  func.func @transform_0(%arg0: i32) -> (i32, i32) {
    %c0_i32 = arith.constant 0 : i32
    %c0_i32_0 = arith.constant 0 : i32
    return %arg0, %c0_i32 : i32, i32
  }
  func.func @transform_1(%arg0: i32) -> (i32, i32) {
    %c0_i32 = arith.constant 0 : i32
    %c0_i32_0 = arith.constant 0 : i32
    return %arg0, %c0_i32 : i32, i32
  }
  func.func @transform_2(%arg0: i32) -> (i32, i32) {
    %c0_i32 = arith.constant 0 : i32
    %c0_i32_0 = arith.constant 0 : i32
    %c0_i32_1 = arith.constant 0 : i32
    return %c0_i32, %c0_i32_0 : i32, i32
  }
  func.func @transform_3(%arg0: i32) -> (i32, i32) {
    %c0_i32 = arith.constant 0 : i32
    %c0_i32_0 = arith.constant 0 : i32
    %c0_i32_1 = arith.constant 0 : i32
    return %c0_i32, %c0_i32_0 : i32, i32
  }
  func.func @transform_4(%arg0: i32) -> (i32, i32) {
    %c0_i32 = arith.constant 0 : i32
    %c0_i32_0 = arith.constant 0 : i32
    %c0_i32_1 = arith.constant 0 : i32
    return %c0_i32, %c0_i32_0 : i32, i32
  }
  func.func @transform_5(%arg0: i32) -> (i32, i32) {
    %c0_i32 = arith.constant 0 : i32
    %c0_i32_0 = arith.constant 0 : i32
    %c0_i32_1 = arith.constant 0 : i32
    return %c0_i32, %c0_i32_0 : i32, i32
  }
  func.func @transform_6(%arg0: i32) -> (i32, i32) {
    %c0_i32 = arith.constant 0 : i32
    %c0_i32_0 = arith.constant 0 : i32
    %c0_i32_1 = arith.constant 0 : i32
    return %c0_i32, %c0_i32_0 : i32, i32
  }
  func.func @transform_7(%arg0: i32) -> (i32, i32) {
    %c0_i32 = arith.constant 0 : i32
    %c0_i32_0 = arith.constant 0 : i32
    return %arg0, %c0_i32 : i32, i32
  }
}

</mosaic_0001>

<bundles_post_ra>
// kernel: tpu_custom_call.1
= control target key start
LH: loop header
LB: loop body
LE: loop exit
PB: predicated region body
PF: predicated region fallthrough
CT: control target
= control target key end

     0   :  { %12 = vsyncpa [#allocation3], 0  ;;  %s3761_s0 = inlined_call_operand.hbm [shape: f32[16,256], index: 0, kind: input, shape index: {}]   ;;  %s3762_s1 = inlined_call_operand.hbm [shape: bf16[16,512], index: 1, kind: input, shape index: {}]   ;;  %s3763_s2 = inlined_call_operand.hbm [shape: bf16[256,512], index: 2, kind: input, shape index: {}]   ;;  %s3764_s3 = inlined_call_operand.hbm [shape: bf16[512,512], index: 3, kind: input, shape index: {}]   ;;  %s3765_s4 = inlined_call_operand.vmem [shape: f32[1,512], index: 4, kind: input, shape index: {}]   ;;  %s3766_s5 = inlined_call_operand.hbm [shape: bf16[512,512], index: 5, kind: input, shape index: {}]   ;;  %s3767_s6 = inlined_call_operand.vmem [shape: f32[1,512], index: 6, kind: input, shape index: {}]   ;;  %s3768_s7 = inlined_call_operand.hbm [shape: f32[16,512], index: 7, kind: output, shape index: {}]  }
   0x1   :  { %13 = vsyncpa [#allocation6], 0 }
   0x2   :  { %14 = vsyncpa [#allocation9], 0 }
   0x3   :  { %15 = vsyncpa [#allocation4], 0  ;;  %s3572_s24 = smov [#allocation5]   ;;  %s3573_s26 = smov [#allocation8]  }
   0x4   :  { %s33_s25 = sshll.u32 %s3572_s24, 4  ;;  %s57_s27 = sshll.u32 %s3573_s26, 4  ;;  %s34_s25 = int_to_ptr.vmem [resolvable:$true] %s33_s25  ;;  %s3622_s27 = int_to_ptr.vmem [resolvable:$true] %s57_s27 }
   0x5   :  { %s3432_s30 = scalar_lea.hbm %s3762_s1, 512 }
   0x6   :  { %p3433_p0 = scmp.ne.s32.totalorder %s3762_s1, %s3432_s30  ;;  %p3436_p1 = scmp.lt.u32.totalorder %s3432_s30, %s3762_s1 }
   0x8   :  { %p3438_p2 = pnand %p3436_p1, %p3433_p0 }
   0xa   :  { %3441 = shalt.err (!%p3438_p2)
}
   0xb   :  { %s3442_s12 = scalar_lea.vmem %s34_s25, 512  ;;  %p3447_p4 = scmp.lt.s32.totalorder %s34_s25, %s34_s25 }
   0xc   :  { %p3443_p3 = scmp.ne.s32.totalorder %s34_s25, %s3442_s12  ;;  %p3448_p5 = scmp.lt.s32.totalorder %s3442_s12, %s3442_s12 }
   0xe   :  { %p3449_p6 = por %p3448_p5, %p3447_p4 }
  0x10   :  { %p3450_p7 = pnand %p3449_p6, %p3443_p3 }
  0x12   :  { %3453 = shalt.err (!%p3450_p7)
}
  0x13   :  { %s3574_s13 = smov 256   ;;  %s3575_s14 = smov 16  }
  0x14   :  { %39 = dma.hbm_to_vmem [thread:$0]  %s3762_s1, 512, %s34_s25, [#allocation6], %s3574_s13, %s3574_s13, %s3575_s14  }
  0x15   :  { %s3454_s19 = scalar_lea.hbm %s3764_s3, 16384 }
  0x16   :  { %p3455_p8 = scmp.ne.s32.totalorder %s3764_s3, %s3454_s19  ;;  %p3458_p9 = scmp.lt.u32.totalorder %s3454_s19, %s3764_s3 }
  0x18   :  { %p3460_p10 = pnand %p3458_p9, %p3455_p8 }
  0x1a   :  { %3463 = shalt.err (!%p3460_p10)
}
  0x1b   :  { %s3464_s24 = scalar_lea.vmem %s3622_s27, 16384  ;;  %p3469_p12 = scmp.lt.s32.totalorder %s3622_s27, %s3622_s27 }
  0x1c   :  { %p3465_p11 = scmp.ne.s32.totalorder %s3622_s27, %s3464_s24  ;;  %p3470_p13 = scmp.lt.s32.totalorder %s3464_s24, %s3464_s24 }
  0x1e   :  { %p3471_p0 = por %p3470_p13, %p3469_p12 }
  0x20   :  { %p3472_p1 = pnand %p3471_p0, %p3465_p11 }
  0x22   :  { %3475 = shalt.err (!%p3472_p1)
}
  0x23   :  { %63 = dma.hbm_to_vmem [thread:$0]  %s3764_s3, 16384, %s3622_s27, [#allocation9], %s3574_s13, %s3574_s13, %s3575_s14  }
  0x24   :  { %s3576_s26 = smov [#allocation2]   ;;  %s3577_s29 = smov [#allocation7]  }
  0x25   :  { %s21_s28 = sshll.u32 %s3576_s26, 4  ;;  %s45_s30 = sshll.u32 %s3577_s29, 4  ;;  %s22_s28 = int_to_ptr.vmem [resolvable:$true] %s21_s28  ;;  %s3659_s30 = int_to_ptr.vmem [resolvable:$true] %s45_s30 }
  0x26   :  { %s3476_s10 = scalar_lea.hbm %s3761_s0, 512 }
  0x27   :  { %p3477_p2 = scmp.ne.s32.totalorder %s3761_s0, %s3476_s10  ;;  %p3480_p3 = scmp.lt.u32.totalorder %s3476_s10, %s3761_s0 }
  0x29   :  { %p3482_p4 = pnand %p3480_p3, %p3477_p2 }
  0x2b   :  { %3485 = shalt.err (!%p3482_p4)
}
  0x2c   :  { %s3486_s3 = scalar_lea.vmem %s22_s28, 512  ;;  %p3491_p6 = scmp.lt.s32.totalorder %s22_s28, %s22_s28 }
  0x2d   :  { %p3487_p5 = scmp.ne.s32.totalorder %s22_s28, %s3486_s3  ;;  %p3492_p7 = scmp.lt.s32.totalorder %s3486_s3, %s3486_s3 }
  0x2f   :  { %p3493_p8 = por %p3492_p7, %p3491_p6 }
  0x31   :  { %p3494_p9 = pnand %p3493_p8, %p3487_p5 }
  0x33   :  { %3497 = shalt.err (!%p3494_p9)
}
  0x34   :  { %27 = dma.hbm_to_vmem [thread:$0]  %s3761_s0, 512, %s22_s28, [#allocation3], %s3574_s13, %s3574_s13, %s3575_s14  }
  0x35   :  { %s3498_s20 = scalar_lea.hbm %s3763_s2, 8192 }
  0x36   :  { %p3499_p10 = scmp.ne.s32.totalorder %s3763_s2, %s3498_s20  ;;  %p3502_p11 = scmp.lt.u32.totalorder %s3498_s20, %s3763_s2 }
  0x38   :  { %p3504_p12 = pnand %p3502_p11, %p3499_p10 }
  0x3a   :  { %3507 = shalt.err (!%p3504_p12)
}
  0x3b   :  { %s3508_s1 = scalar_lea.vmem %s3659_s30, 8192  ;;  %p3513_p0 = scmp.lt.s32.totalorder %s3659_s30, %s3659_s30 }
  0x3c   :  { %p3509_p13 = scmp.ne.s32.totalorder %s3659_s30, %s3508_s1  ;;  %p3514_p1 = scmp.lt.s32.totalorder %s3508_s1, %s3508_s1 }
  0x3e   :  { %p3515_p2 = por %p3514_p1, %p3513_p0 }
  0x40   :  { %p3516_p3 = pnand %p3515_p2, %p3509_p13 }
  0x42   :  { %3519 = shalt.err (!%p3516_p3)
}
  0x43   :  { %51 = dma.hbm_to_vmem [thread:$0]  %s3763_s2, 8192, %s3659_s30, [#allocation6], %s3574_s13, %s3574_s13, %s3575_s14  }
  0x44   :  { %s3578_s26 = smov [#allocation10]   ;;  %s3520_s9 = scalar_lea.hbm %s3766_s5, 16384 }
  0x45   :  { %s71_s28 = sshll.u32 %s3578_s26, 4  ;;  %p3521_p4 = scmp.ne.s32.totalorder %s3766_s5, %s3520_s9  ;;  %s72_s28 = int_to_ptr.vmem [resolvable:$true] %s71_s28 }
  0x46   :  { %p3524_p5 = scmp.lt.u32.totalorder %s3520_s9, %s3766_s5 }
  0x48   :  { %p3526_p6 = pnand %p3524_p5, %p3521_p4 }
  0x4a   :  { %3529 = shalt.err (!%p3526_p6)
}
  0x4b   :  { %s3530_s16 = scalar_lea.vmem %s72_s28, 16384  ;;  %p3535_p8 = scmp.lt.s32.totalorder %s72_s28, %s72_s28 }
  0x4c   :  { %p3531_p7 = scmp.ne.s32.totalorder %s72_s28, %s3530_s16  ;;  %p3536_p9 = scmp.lt.s32.totalorder %s3530_s16, %s3530_s16 }
  0x4e   :  { %p3537_p10 = por %p3536_p9, %p3535_p8 }
  0x50   :  { %p3538_p11 = pnand %p3537_p10, %p3531_p7 }
  0x52   :  { %3541 = shalt.err (!%p3538_p11)
}
  0x53   :  { %77 = dma.hbm_to_vmem [thread:$0]  %s3766_s5, 16384, %s72_s28, [#allocation9], %s3574_s13, %s3574_s13, %s3575_s14  }
  0x54   :  { %3564 = dma.done.wait [#allocation3], 512  }
  0x55   :  { %3565 = vsyncadd [#allocation3], 4294966784 }
  0x56   :  { %3566 = dma.done.wait [#allocation6], 8704  }
  0x57   :  { %3567 = vsyncadd [#allocation6], 4294958592 }
  0x58   :  { %3568 = dma.done.wait [#allocation9], 32768  }
  0x59   :  { %3569 = vsyncadd [#allocation9], 4294934528  ;;  %v2952_v0 = vld [vmem:[#allocation7 + $0x4] ss:$16 sps:$4 sm:$0xff]   ;;  %v2954_v1 = vld [vmem:[#allocation7] ss:$16 sps:$4 sm:$0xff]  }
  0x5a   :  { %497 = vmatprep.subr.bf16.mxu0 %v2952_v0  ;;  %v2955_v2 = vld [vmem:[#allocation7 + $0x24] ss:$16 sps:$4 sm:$0xff]   ;;  %v2957_v3 = vld [vmem:[#allocation7 + $0x20] ss:$16 sps:$4 sm:$0xff]   ;;  %v2997_v13 = vld [vmem:[#allocation7 + $0xc] ss:$16 sps:$4 sm:$0xff]  }
  0x5b   :  { %498 = vmatpush1.bf16.msra.mxu0 %v2954_v1  ;;  %v2958_v4 = vld [vmem:[#allocation7 + $0x44] ss:$16 sps:$4 sm:$0xff]   ;;  %v2960_v5 = vld [vmem:[#allocation7 + $0x40] ss:$16 sps:$4 sm:$0xff]   ;;  %v2999_v14 = vld [vmem:[#allocation7 + $0x8] ss:$16 sps:$4 sm:$0xff]   ;;  %540 = vmatprep.subr.bf16.mxu1 %v2997_v13 }
  0x5c   :  { %499 = vmatprep.subr.bf16.mxu0 %v2955_v2  ;;  %v2961_v6 = vld [vmem:[#allocation7 + $0x64] ss:$16 sps:$4 sm:$0xff]   ;;  %v2963_v7 = vld [vmem:[#allocation7 + $0x60] ss:$16 sps:$4 sm:$0xff]   ;;  %541 = vmatpush1.bf16.msra.mxu1 %v2999_v14  ;;  %v3003_v16 = vld [vmem:[#allocation7 + $0x2c] ss:$16 sps:$4 sm:$0xff]  }
  0x5d   :  { %v2964_v8 = vld [vmem:[#allocation7 + $0x84] ss:$16 sps:$4 sm:$0xff]   ;;  %v2966_v9 = vld [vmem:[#allocation7 + $0x80] ss:$16 sps:$4 sm:$0xff]   ;;  %v96_v17 = vld [vmem:[#allocation2 + $0x8] sm:$0xff]  ;;  %542 = vmatprep.subr.bf16.mxu1 %v3003_v16  ;;  %s3579_s3 = smov [#allocation11]  }
  0x5e   :  { %v2967_v10 = vld [vmem:[#allocation7 + $0xa4] ss:$16 sps:$4 sm:$0xff]   ;;  %v2969_v11 = vld [vmem:[#allocation7 + $0xa0] ss:$16 sps:$4 sm:$0xff]   ;;  %v98_v19 = vld [vmem:[#allocation2 + $0x18] sm:$0xff]  ;;  %s2576_s27 = sshll.u32 %s3579_s3, 4  ;;  %s2577_s27 = int_to_ptr.vmem [resolvable:$true] %s2576_s27 }
  0x5f   :  { %500 = vmatpush1.bf16.msra.mxu0 %v2957_v3  ;;  %v2970_v12 = vld [vmem:[#allocation7 + $0xc4] ss:$16 sps:$4 sm:$0xff]   ;;  %v2972_v15 = vld [vmem:[#allocation7 + $0xc0] ss:$16 sps:$4 sm:$0xff]   ;;  %v3005_v20 = vld [vmem:[#allocation7 + $0x28] ss:$16 sps:$4 sm:$0xff]   ;;  %v100_v21 = vpack.c.bf16 %v98_v19, %v96_v17  ;;  %p3547_p13 = scmp.lt.s32.totalorder %s2577_s27, %s2577_s27 }
  0x60   :  { %501 = vmatprep.subr.bf16.mxu0 %v2958_v4  ;;  %v2973_v18 = vld [vmem:[#allocation7 + $0xe4] ss:$16 sps:$4 sm:$0xff]   ;;  %v3006_v22 = vld [vmem:[#allocation7 + $0x4c] ss:$16 sps:$4 sm:$0xff]   ;;  %v2975_v23 = vld [vmem:[#allocation7 + $0xe0] ss:$16 sps:$4 sm:$0xff]   ;;  %543 = vmatpush1.bf16.msra.mxu1 %v3005_v20 }
  0x61   :  { %v2976_v24 = vld [vmem:[#allocation7 + $0x104] ss:$16 sps:$4 sm:$0xff]   ;;  %529 = vmatprep.mubr.bf16.mxu0 %v100_v21  ;;  %v3008_v25 = vld [vmem:[#allocation7 + $0x48] ss:$16 sps:$4 sm:$0xff]   ;;  %544 = vmatprep.subr.bf16.mxu1 %v3006_v22  ;;  %v3009_v26 = vld [vmem:[#allocation7 + $0x6c] ss:$16 sps:$4 sm:$0xff]  }
  0x62   :  { %572 = vmatprep.mubr.bf16.mxu1 %v100_v21  ;;  %v2978_v27 = vld [vmem:[#allocation7 + $0x100] ss:$16 sps:$4 sm:$0xff]   ;;  %v2979_v28 = vld [vmem:[#allocation7 + $0x124] ss:$16 sps:$4 sm:$0xff]   ;;  %v3011_v29 = vld [vmem:[#allocation7 + $0x68] ss:$16 sps:$4 sm:$0xff]  }
  0x63   :  { %502 = vmatpush1.bf16.msra.mxu0 %v2960_v5  ;;  %v3012_v30 = vld [vmem:[#allocation7 + $0x8c] ss:$16 sps:$4 sm:$0xff]   ;;  %v2981_v31 = vld [vmem:[#allocation7 + $0x120] ss:$16 sps:$4 sm:$0xff]   ;;  %v2982_v32 = vld [vmem:[#allocation7 + $0x144] ss:$16 sps:$4 sm:$0xff]  }
  0x64   :  { %503 = vmatprep.subr.bf16.mxu0 %v2961_v6  ;;  %545 = vmatpush1.bf16.msra.mxu1 %v3008_v25  ;;  %v3014_v33 = vld [vmem:[#allocation7 + $0x88] ss:$16 sps:$4 sm:$0xff]   ;;  %v3015_v34 = vld [vmem:[#allocation7 + $0xac] ss:$16 sps:$4 sm:$0xff]   ;;  %v2984_v35 = vld [vmem:[#allocation7 + $0x140] ss:$16 sps:$4 sm:$0xff]  }
  0x65   :  { %546 = vmatprep.subr.bf16.mxu1 %v3009_v26  ;;  %v2985_v36 = vld [vmem:[#allocation7 + $0x164] ss:$16 sps:$4 sm:$0xff]   ;;  %v3017_v37 = vld [vmem:[#allocation7 + $0xa8] ss:$16 sps:$4 sm:$0xff]   ;;  %v3018_v38 = vld [vmem:[#allocation7 + $0xcc] ss:$16 sps:$4 sm:$0xff]  }
  0x66   :  { %v2987_v39 = vld [vmem:[#allocation7 + $0x160] ss:$16 sps:$4 sm:$0xff]   ;;  %v2988_v40 = vld [vmem:[#allocation7 + $0x184] ss:$16 sps:$4 sm:$0xff]   ;;  %v3020_v41 = vld [vmem:[#allocation7 + $0xc8] ss:$16 sps:$4 sm:$0xff]  }
  0x67   :  { %504 = vmatpush1.bf16.msra.mxu0 %v2963_v7  ;;  %v3021_v42 = vld [vmem:[#allocation7 + $0xec] ss:$16 sps:$4 sm:$0xff]   ;;  %v2990_v43 = vld [vmem:[#allocation7 + $0x180] ss:$16 sps:$4 sm:$0xff]   ;;  %v2991_v44 = vld [vmem:[#allocation7 + $0x1a4] ss:$16 sps:$4 sm:$0xff]  }
  0x68   :  { %505 = vmatprep.subr.bf16.mxu0 %v2964_v8  ;;  %547 = vmatpush1.bf16.msra.mxu1 %v3011_v29  ;;  %v3023_v45 = vld [vmem:[#allocation7 + $0xe8] ss:$16 sps:$4 sm:$0xff]   ;;  %v3024_v46 = vld [vmem:[#allocation7 + $0x10c] ss:$16 sps:$4 sm:$0xff]   ;;  %v2993_v47 = vld [vmem:[#allocation7 + $0x1a0] ss:$16 sps:$4 sm:$0xff]  }
  0x69   :  { %548 = vmatprep.subr.bf16.mxu1 %v3012_v30  ;;  %v2994_v48 = vld [vmem:[#allocation7 + $0x1c4] ss:$16 sps:$4 sm:$0xff]   ;;  %v3026_v49 = vld [vmem:[#allocation7 + $0x108] ss:$16 sps:$4 sm:$0xff]   ;;  %v3027_v50 = vld [vmem:[#allocation7 + $0x12c] ss:$16 sps:$4 sm:$0xff]  }
  0x6a   :  { %v2996_v51 = vld [vmem:[#allocation7 + $0x1c0] ss:$16 sps:$4 sm:$0xff]   ;;  %v3000_v52 = vld [vmem:[#allocation7 + $0x1e4] ss:$16 sps:$4 sm:$0xff]   ;;  %v3029_v53 = vld [vmem:[#allocation7 + $0x128] ss:$16 sps:$4 sm:$0xff]  }
  0x6b   :  { %506 = vmatpush1.bf16.msra.mxu0 %v2966_v9  ;;  %v3030_v54 = vld [vmem:[#allocation7 + $0x14c] ss:$16 sps:$4 sm:$0xff]   ;;  %v3002_v55 = vld [vmem:[#allocation7 + $0x1e0] ss:$16 sps:$4 sm:$0xff]   ;;  %v3032_v58 = vld [vmem:[#allocation7 + $0x148] ss:$16 sps:$4 sm:$0xff]  }
  0x6c   :  { %507 = vmatprep.subr.bf16.mxu0 %v2967_v10  ;;  %549 = vmatpush1.bf16.msra.mxu1 %v3014_v33  ;;  %v95_v56 = vld [vmem:[#allocation2] sm:$0xff]  ;;  %v97_v57 = vld [vmem:[#allocation2 + $0x10] sm:$0xff]  ;;  %v3033_v60 = vld [vmem:[#allocation7 + $0x16c] ss:$16 sps:$4 sm:$0xff]  }
  0x6d   :  { %550 = vmatprep.subr.bf16.mxu1 %v3015_v34  ;;  %v3050_v59 = vld [vmem:[#allocation8 + $0x4] ss:$16 sps:$4 sm:$0xff]   ;;  %v99_v61 = vpack.c.bf16 %v97_v57, %v95_v56  ;;  %v3035_v62 = vld [vmem:[#allocation7 + $0x168] ss:$16 sps:$4 sm:$0xff]   ;;  %v3048_v63 = vld [vmem:[#allocation8] ss:$16 sps:$4 sm:$0xff]  }
  0x6e   :  { %v3056_v0 = vld [vmem:[#allocation8 + $0x24] ss:$16 sps:$4 sm:$0xff]   ;;  %v3036_v1 = vld [vmem:[#allocation7 + $0x18c] ss:$16 sps:$4 sm:$0xff]   ;;  %v3038_v2 = vld [vmem:[#allocation7 + $0x188] ss:$16 sps:$4 sm:$0xff]  }
  0x6f   :  { %508 = vmatpush1.bf16.msra.mxu0 %v2969_v11  ;;  %v3054_v3 = vld [vmem:[#allocation8 + $0x20] ss:$16 sps:$4 sm:$0xff]   ;;  %v3062_v4 = vld [vmem:[#allocation8 + $0x44] ss:$16 sps:$4 sm:$0xff]   ;;  %v3039_v5 = vld [vmem:[#allocation7 + $0x1ac] ss:$16 sps:$4 sm:$0xff]  }
  0x70   :  { %509 = vmatprep.subr.bf16.mxu0 %v2970_v12  ;;  %551 = vmatpush1.bf16.msra.mxu1 %v3017_v37  ;;  %v3041_v6 = vld [vmem:[#allocation7 + $0x1a8] ss:$16 sps:$4 sm:$0xff]   ;;  %v3060_v7 = vld [vmem:[#allocation8 + $0x40] ss:$16 sps:$4 sm:$0xff]   ;;  %v3068_v8 = vld [vmem:[#allocation8 + $0x64] ss:$16 sps:$4 sm:$0xff]  }
  0x71   :  { %552 = vmatprep.subr.bf16.mxu1 %v3018_v38  ;;  %v3042_v9 = vld [vmem:[#allocation7 + $0x1cc] ss:$16 sps:$4 sm:$0xff]   ;;  %v3044_v10 = vld [vmem:[#allocation7 + $0x1c8] ss:$16 sps:$4 sm:$0xff]   ;;  %v3066_v11 = vld [vmem:[#allocation8 + $0x60] ss:$16 sps:$4 sm:$0xff]  }
  0x72   :  { %v3074_v12 = vld [vmem:[#allocation8 + $0x84] ss:$16 sps:$4 sm:$0xff]   ;;  %v3045_v13 = vld [vmem:[#allocation7 + $0x1ec] ss:$16 sps:$4 sm:$0xff]   ;;  %v3047_v14 = vld [vmem:[#allocation7 + $0x1e8] ss:$16 sps:$4 sm:$0xff]  }
  0x73   :  { %510 = vmatpush1.bf16.msra.mxu0 %v2972_v15  ;;  %v3072_v15 = vld [vmem:[#allocation8 + $0x80] ss:$16 sps:$4 sm:$0xff]   ;;  %v3080_v16 = vld [vmem:[#allocation8 + $0xa4] ss:$16 sps:$4 sm:$0xff]   ;;  %v3053_v17 = vld [vmem:[#allocation8 + $0xc] ss:$16 sps:$4 sm:$0xff]  }
  0x74   :  { %511 = vmatprep.subr.bf16.mxu0 %v2973_v18  ;;  %553 = vmatpush1.bf16.msra.mxu1 %v3020_v41  ;;  %v3078_v18 = vld [vmem:[#allocation8 + $0xa0] ss:$16 sps:$4 sm:$0xff]   ;;  %v3051_v19 = vld [vmem:[#allocation8 + $0x8] ss:$16 sps:$4 sm:$0xff]   ;;  %v3086_v20 = vld [vmem:[#allocation8 + $0xc4] ss:$16 sps:$4 sm:$0xff]  }
  0x75   :  { %554 = vmatprep.subr.bf16.mxu1 %v3021_v42  ;;  %v3059_v21 = vld [vmem:[#allocation8 + $0x2c] ss:$16 sps:$4 sm:$0xff]   ;;  %v3084_v22 = vld [vmem:[#allocation8 + $0xc0] ss:$16 sps:$4 sm:$0xff]   ;;  %v3117_v57 = vld [vmem:[#allocation8 + $0x168] ss:$16 sps:$4 sm:$0xff]  }
  0x76   :  { %v3065_v25 = vld [vmem:[#allocation8 + $0x4c] ss:$16 sps:$4 sm:$0xff]   ;;  %v3090_v26 = vld [vmem:[#allocation8 + $0xe0] ss:$16 sps:$4 sm:$0xff]  }
  0x77   :  { %512 = vmatpush1.bf16.msra.mxu0 %v2975_v23  ;;  %v3057_v23 = vld [vmem:[#allocation8 + $0x28] ss:$16 sps:$4 sm:$0xff]   ;;  %v3071_v29 = vld [vmem:[#allocation8 + $0x6c] ss:$16 sps:$4 sm:$0xff]   ;;  %v3096_v30 = vld [vmem:[#allocation8 + $0x100] ss:$16 sps:$4 sm:$0xff]  }
  0x78   :  { %513 = vmatprep.subr.bf16.mxu0 %v2976_v24  ;;  %555 = vmatpush1.bf16.msra.mxu1 %v3023_v45  ;;  %v3092_v24 = vld [vmem:[#allocation8 + $0xe4] ss:$16 sps:$4 sm:$0xff]   ;;  %v3077_v33 = vld [vmem:[#allocation8 + $0x8c] ss:$16 sps:$4 sm:$0xff]   ;;  %v3102_v34 = vld [vmem:[#allocation8 + $0x120] ss:$16 sps:$4 sm:$0xff]  }
  0x79   :  { %556 = vmatprep.subr.bf16.mxu1 %v3024_v46  ;;  %v3083_v37 = vld [vmem:[#allocation8 + $0xac] ss:$16 sps:$4 sm:$0xff]   ;;  %v3108_v38 = vld [vmem:[#allocation8 + $0x140] ss:$16 sps:$4 sm:$0xff]  }
  0x7a   :  { %v3089_v41 = vld [vmem:[#allocation8 + $0xcc] ss:$16 sps:$4 sm:$0xff]   ;;  %v3114_v42 = vld [vmem:[#allocation8 + $0x160] ss:$16 sps:$4 sm:$0xff]  }
  0x7b   :  { %514 = vmatpush1.bf16.msra.mxu0 %v2978_v27  ;;  %v3063_v27 = vld [vmem:[#allocation8 + $0x48] ss:$16 sps:$4 sm:$0xff]   ;;  %v3095_v45 = vld [vmem:[#allocation8 + $0xec] ss:$16 sps:$4 sm:$0xff]   ;;  %v3120_v46 = vld [vmem:[#allocation8 + $0x180] ss:$16 sps:$4 sm:$0xff]  }
  0x7c   :  { %515 = vmatprep.subr.bf16.mxu0 %v2979_v28  ;;  %557 = vmatpush1.bf16.msra.mxu1 %v3026_v49  ;;  %v3098_v28 = vld [vmem:[#allocation8 + $0x104] ss:$16 sps:$4 sm:$0xff]   ;;  %v3101_v49 = vld [vmem:[#allocation8 + $0x10c] ss:$16 sps:$4 sm:$0xff]  }
  0x7d   :  { %558 = vmatprep.subr.bf16.mxu1 %v3027_v50  ;;  %v3126_v50 = vld [vmem:[#allocation8 + $0x1a0] ss:$16 sps:$4 sm:$0xff]   ;;  %v3119_v56 = vld [vmem:[#allocation8 + $0x16c] ss:$16 sps:$4 sm:$0xff]  }
  0x7f   :  { %516 = vmatpush1.bf16.msra.mxu0 %v2981_v31  ;;  %v3069_v31 = vld [vmem:[#allocation8 + $0x68] ss:$16 sps:$4 sm:$0xff]  }
  0x80   :  { %517 = vmatprep.subr.bf16.mxu0 %v2982_v32  ;;  %559 = vmatpush1.bf16.msra.mxu1 %v3029_v53  ;;  %v3104_v32 = vld [vmem:[#allocation8 + $0x124] ss:$16 sps:$4 sm:$0xff]   ;;  %v3105_v53 = vld [vmem:[#allocation8 + $0x128] ss:$16 sps:$4 sm:$0xff]  }
  0x81   :  { %560 = vmatprep.subr.bf16.mxu1 %v3030_v54  ;;  %v3113_v54 = vld [vmem:[#allocation8 + $0x14c] ss:$16 sps:$4 sm:$0xff]  }
  0x83   :  { %518 = vmatpush1.bf16.msra.mxu0 %v2984_v35  ;;  %v3075_v35 = vld [vmem:[#allocation8 + $0x88] ss:$16 sps:$4 sm:$0xff]  }
  0x84   :  { %519 = vmatprep.subr.bf16.mxu0 %v2985_v36  ;;  %561 = vmatpush1.bf16.msra.mxu1 %v3032_v58  ;;  %v3110_v36 = vld [vmem:[#allocation8 + $0x144] ss:$16 sps:$4 sm:$0xff]   ;;  %v3125_v58 = vld [vmem:[#allocation8 + $0x18c] ss:$16 sps:$4 sm:$0xff]  }
  0x85   :  { %562 = vmatprep.subr.bf16.mxu1 %v3033_v60  ;;  %v3131_v60 = vld [vmem:[#allocation8 + $0x1ac] ss:$16 sps:$4 sm:$0xff]  }
  0x87   :  { %520 = vmatpush1.bf16.msra.mxu0 %v2987_v39  ;;  %v3081_v39 = vld [vmem:[#allocation8 + $0xa8] ss:$16 sps:$4 sm:$0xff]  }
  0x88   :  { %521 = vmatprep.subr.bf16.mxu0 %v2988_v40  ;;  %563 = vmatpush1.bf16.msra.mxu1 %v3035_v62  ;;  %v3116_v40 = vld [vmem:[#allocation8 + $0x164] ss:$16 sps:$4 sm:$0xff]  }
  0x89   :  { %564 = vmatprep.subr.bf16.mxu1 %v3036_v1  ;;  %v3134_v62 = vld [vmem:[#allocation8 + $0x1c4] ss:$16 sps:$4 sm:$0xff]   ;;  %v3135_v1 = vld [vmem:[#allocation8 + $0x1c8] ss:$16 sps:$4 sm:$0xff]  }
  0x8b   :  { %522 = vmatpush1.bf16.msra.mxu0 %v2990_v43  ;;  %v3087_v43 = vld [vmem:[#allocation8 + $0xc8] ss:$16 sps:$4 sm:$0xff]  }
  0x8c   :  { %523 = vmatprep.subr.bf16.mxu0 %v2991_v44  ;;  %565 = vmatpush1.bf16.msra.mxu1 %v3038_v2  ;;  %v3122_v44 = vld [vmem:[#allocation8 + $0x184] ss:$16 sps:$4 sm:$0xff]  }
  0x8d   :  { %566 = vmatprep.subr.bf16.mxu1 %v3039_v5  ;;  %v3140_v2 = vld [vmem:[#allocation8 + $0x1e4] ss:$16 sps:$4 sm:$0xff]   ;;  %v3141_v5 = vld [vmem:[#allocation8 + $0x1e8] ss:$16 sps:$4 sm:$0xff]  }
  0x8f   :  { %524 = vmatpush1.bf16.msra.mxu0 %v2993_v47  ;;  %v3093_v47 = vld [vmem:[#allocation8 + $0xe8] ss:$16 sps:$4 sm:$0xff]  }
  0x90   :  { %525 = vmatprep.subr.bf16.mxu0 %v2994_v48  ;;  %567 = vmatpush1.bf16.msra.mxu1 %v3041_v6  ;;  %v3128_v48 = vld [vmem:[#allocation8 + $0x1a4] ss:$16 sps:$4 sm:$0xff]  }
  0x91   :  { %568 = vmatprep.subr.bf16.mxu1 %v3042_v9  ;;  %v3146_v6 = vld [vmem:[#allocation8 + $0x204] ss:$16 sps:$4 sm:$0xff]  }
  0x92   :  { %v167_v9 = vld [vmem:[#allocation5 + $0x10] sm:$0xff] }
  0x93   :  { %526 = vmatpush1.bf16.msra.mxu0 %v2996_v51  ;;  %v3099_v51 = vld [vmem:[#allocation8 + $0x108] ss:$16 sps:$4 sm:$0xff]  }
  0x94   :  { %527 = vmatprep.subr.bf16.mxu0 %v3000_v52  ;;  %569 = vmatpush1.bf16.msra.mxu1 %v3044_v10  ;;  %v3107_v52 = vld [vmem:[#allocation8 + $0x12c] ss:$16 sps:$4 sm:$0xff]  }
  0x95   :  { %570 = vmatprep.subr.bf16.mxu1 %v3045_v13 }
  0x97   :  { %528 = vmatpush1.bf16.msra.mxu0 %v3002_v55  ;;  %v3111_v55 = vld [vmem:[#allocation8 + $0x148] ss:$16 sps:$4 sm:$0xff]  }
  0x98   :  { %1401 = vmatprep.subr.bf16.mxu0 %v3050_v59  ;;  %571 = vmatpush1.bf16.msra.mxu1 %v3047_v14  ;;  %v3123_v59 = vld [vmem:[#allocation8 + $0x188] ss:$16 sps:$4 sm:$0xff]   ;;  %v174_v14 = vunpack.c.h.bf16 %v167_v9 }
  0x99   :  { %1487 = vmatprep.subr.bf16.mxu1 %v3053_v17 }
  0x9a   :  { %530 = vmatmul.mubr.bf16.vlgmr.msra.gmra.mrb[0].mxu0 %v99_v61 }
  0x9b   :  { %1402 = vmatpush1.bf16.msra.mxu0 %v3048_v63  ;;  %573 = vmatmul.mubr.bf16.vlgmr.msra.gmra.mrb[0].mxu1 %v99_v61  ;;  %v3129_v61 = vld [vmem:[#allocation8 + $0x1a8] ss:$16 sps:$4 sm:$0xff]   ;;  %v3137_v63 = vld [vmem:[#allocation8 + $0x1cc] ss:$16 sps:$4 sm:$0xff]  }
  0x9c   :  { %1403 = vmatprep.subr.bf16.mxu0 %v3056_v0  ;;  %1488 = vmatpush1.bf16.msra.mxu1 %v3051_v19  ;;  %v3132_v0 = vld [vmem:[#allocation8 + $0x1c0] ss:$16 sps:$4 sm:$0xff]  }
  0x9d   :  { %1489 = vmatprep.subr.bf16.mxu1 %v3059_v21 }
  0x9f   :  { %1404 = vmatpush1.bf16.msra.mxu0 %v3054_v3  ;;  %v3143_v3 = vld [vmem:[#allocation8 + $0x1ec] ss:$16 sps:$4 sm:$0xff]  }
  0xa0   :  { %1405 = vmatprep.subr.bf16.mxu0 %v3062_v4  ;;  %1490 = vmatpush1.bf16.msra.mxu1 %v3057_v23  ;;  %v3138_v4 = vld [vmem:[#allocation8 + $0x1e0] ss:$16 sps:$4 sm:$0xff]  }
  0xa1   :  { %1491 = vmatprep.subr.bf16.mxu1 %v3065_v25 }
  0xa3   :  { %1406 = vmatpush1.bf16.msra.mxu0 %v3060_v7  ;;  %v3149_v7 = vld [vmem:[#allocation8 + $0x20c] ss:$16 sps:$4 sm:$0xff]  }
  0xa4   :  { %1407 = vmatprep.subr.bf16.mxu0 %v3068_v8  ;;  %1492 = vmatpush1.bf16.msra.mxu1 %v3063_v27  ;;  %v165_v8 = vld [vmem:[#allocation5] sm:$0xff] }
  0xa5   :  { %1493 = vmatprep.subr.bf16.mxu1 %v3071_v29  ;;  %v169_v10 = vunpack.c.l.bf16 %v165_v8 }
  0xa7   :  { %1408 = vmatpush1.bf16.msra.mxu0 %v3066_v11  ;;  %v170_v11 = vunpack.c.h.bf16 %v165_v8 }
  0xa8   :  { %1409 = vmatprep.subr.bf16.mxu0 %v3074_v12  ;;  %1494 = vmatpush1.bf16.msra.mxu1 %v3069_v31  ;;  %v173_v12 = vunpack.c.l.bf16 %v167_v9  ;;  %v3174_v9 = vld [vmem:[#allocation8 + $0x2a0] ss:$16 sps:$4 sm:$0xff]  }
  0xa9   :  { %1495 = vmatprep.subr.bf16.mxu1 %v3077_v33  ;;  %v3147_v33 = vld [vmem:[#allocation8 + $0x208] ss:$16 sps:$4 sm:$0xff]  }
  0xab   :  { %1410 = vmatpush1.bf16.msra.mxu0 %v3072_v15 }
  0xac   :  { %1411 = vmatprep.subr.bf16.mxu0 %v3080_v16  ;;  %1496 = vmatpush1.bf16.msra.mxu1 %v3075_v35  ;;  %v3155_v35 = vld [vmem:[#allocation8 + $0x22c] ss:$16 sps:$4 sm:$0xff]  }
  0xad   :  { %1497 = vmatprep.subr.bf16.mxu1 %v3083_v37  ;;  %v3153_v37 = vld [vmem:[#allocation8 + $0x228] ss:$16 sps:$4 sm:$0xff]  }
  0xaf   :  { %1412 = vmatpush1.bf16.msra.mxu0 %v3078_v18 }
  0xb0   :  { %1413 = vmatprep.subr.bf16.mxu0 %v3086_v20  ;;  %1498 = vmatpush1.bf16.msra.mxu1 %v3081_v39  ;;  %v3161_v39 = vld [vmem:[#allocation8 + $0x24c] ss:$16 sps:$4 sm:$0xff]  }
  0xb1   :  { %1499 = vmatprep.subr.bf16.mxu1 %v3089_v41  ;;  %v3156_v41 = vld [vmem:[#allocation8 + $0x240] ss:$16 sps:$4 sm:$0xff]  }
  0xb3   :  { %1414 = vmatpush1.bf16.msra.mxu0 %v3084_v22 }
  0xb4   :  { %1415 = vmatprep.subr.bf16.mxu0 %v3092_v24  ;;  %1500 = vmatpush1.bf16.msra.mxu1 %v3087_v43  ;;  %v168_v43 = vld [vmem:[#allocation5 + $0x18] sm:$0xff] }
  0xb5   :  { %1501 = vmatprep.subr.bf16.mxu1 %v3095_v45  ;;  %v3167_v45 = vld [vmem:[#allocation8 + $0x26c] ss:$16 sps:$4 sm:$0xff]  }
  0xb7   :  { %1416 = vmatpush1.bf16.msra.mxu0 %v3090_v26 }
  0xb8   :  { %1417 = vmatprep.subr.bf16.mxu0 %v3098_v28  ;;  %1502 = vmatpush1.bf16.msra.mxu1 %v3093_v47 }
  0xb9   :  { %1503 = vmatprep.subr.bf16.mxu1 %v3101_v49  ;;  %v3162_v49 = vld [vmem:[#allocation8 + $0x260] ss:$16 sps:$4 sm:$0xff]  }
  0xbb   :  { %1418 = vmatpush1.bf16.msra.mxu0 %v3096_v30 }
  0xbc   :  { %1419 = vmatprep.subr.bf16.mxu0 %v3104_v32  ;;  %1504 = vmatpush1.bf16.msra.mxu1 %v3099_v51  ;;  %v3144_v32 = vld [vmem:[#allocation8 + $0x200] ss:$16 sps:$4 sm:$0xff]  }
  0xbd   :  { %1505 = vmatprep.subr.bf16.mxu1 %v3107_v52  ;;  %v176_v52 = vunpack.c.h.bf16 %v168_v43 }
  0xbf   :  { %1420 = vmatpush1.bf16.msra.mxu0 %v3102_v34  ;;  %v3152_v34 = vld [vmem:[#allocation8 + $0x224] ss:$16 sps:$4 sm:$0xff]  }
  0xc0   :  { %1421 = vmatprep.subr.bf16.mxu0 %v3110_v36  ;;  %1506 = vmatpush1.bf16.msra.mxu1 %v3105_v53  ;;  %v3150_v36 = vld [vmem:[#allocation8 + $0x220] ss:$16 sps:$4 sm:$0xff]   ;;  %v3170_v53 = vld [vmem:[#allocation8 + $0x284] ss:$16 sps:$4 sm:$0xff]  }
  0xc1   :  { %1507 = vmatprep.subr.bf16.mxu1 %v3113_v54  ;;  %v3173_v54 = vld [vmem:[#allocation8 + $0x28c] ss:$16 sps:$4 sm:$0xff]  }
  0xc3   :  { %1422 = vmatpush1.bf16.msra.mxu0 %v3108_v38  ;;  %v3158_v38 = vld [vmem:[#allocation8 + $0x244] ss:$16 sps:$4 sm:$0xff]  }
  0xc4   :  { %1423 = vmatprep.subr.bf16.mxu0 %v3116_v40  ;;  %1508 = vmatpush1.bf16.msra.mxu1 %v3111_v55  ;;  %v166_v40 = vld [vmem:[#allocation5 + $0x8] sm:$0xff] }
  0xc5   :  { %1509 = vmatprep.subr.bf16.mxu1 %v3119_v56  ;;  %v172_v47 = vunpack.c.h.bf16 %v166_v40 }
  0xc7   :  { %1424 = vmatpush1.bf16.msra.mxu0 %v3114_v42  ;;  %v3159_v42 = vld [vmem:[#allocation8 + $0x248] ss:$16 sps:$4 sm:$0xff]  }
  0xc8   :  { %1425 = vmatprep.subr.bf16.mxu0 %v3122_v44  ;;  %1510 = vmatpush1.bf16.msra.mxu1 %v3117_v57  ;;  %v3164_v44 = vld [vmem:[#allocation8 + $0x264] ss:$16 sps:$4 sm:$0xff]   ;;  %v3168_v57 = vld [vmem:[#allocation8 + $0x280] ss:$16 sps:$4 sm:$0xff]  }
  0xc9   :  { %1511 = vmatprep.subr.bf16.mxu1 %v3125_v58 }
  0xcb   :  { %1426 = vmatpush1.bf16.msra.mxu0 %v3120_v46  ;;  %v171_v46 = vunpack.c.l.bf16 %v166_v40  ;;  %v3216_v40 = vld [vmem:[#allocation8 + $0x380] ss:$16 sps:$4 sm:$0xff]  }
  0xcc   :  { %1427 = vmatprep.subr.bf16.mxu0 %v3128_v48  ;;  %1512 = vmatpush1.bf16.msra.mxu1 %v3123_v59  ;;  %v175_v48 = vunpack.c.l.bf16 %v168_v43  ;;  %v3227_v43 = vld [vmem:[#allocation8 + $0x3ac] ss:$16 sps:$4 sm:$0xff]  }
  0xcd   :  { %1513 = vmatprep.subr.bf16.mxu1 %v3131_v60  ;;  %v3171_v60 = vld [vmem:[#allocation8 + $0x288] ss:$16 sps:$4 sm:$0xff]  }
  0xcf   :  { %1428 = vmatpush1.bf16.msra.mxu0 %v3126_v50  ;;  %v3165_v50 = vld [vmem:[#allocation8 + $0x268] ss:$16 sps:$4 sm:$0xff]  }
  0xd0   :  { %1514 = vmatpush1.bf16.msra.mxu1 %v3129_v61  ;;  %1429 = vmatprep.subr.bf16.mxu0 %v3134_v62 }
  0xd1   :  { %1515 = vmatprep.subr.bf16.mxu1 %v3137_v63 }
  0xd3   :  { %1430 = vmatpush1.bf16.msra.mxu0 %v3132_v0  ;;  %v3176_v0 = vld [vmem:[#allocation8 + $0x2a4] ss:$16 sps:$4 sm:$0xff]  }
  0xd4   :  { %1516 = vmatpush1.bf16.msra.mxu1 %v3135_v1  ;;  %1431 = vmatprep.subr.bf16.mxu0 %v3140_v2 }
  0xd5   :  { %1517 = vmatprep.subr.bf16.mxu1 %v3143_v3  ;;  %v3179_v3 = vld [vmem:[#allocation8 + $0x2ac] ss:$16 sps:$4 sm:$0xff]  }
  0xd7   :  { %1432 = vmatpush1.bf16.msra.mxu0 %v3138_v4 }
  0xd8   :  { %1518 = vmatpush1.bf16.msra.mxu1 %v3141_v5  ;;  %1444 = vmatprep.subr.bf16.mxu0 %v3146_v6 }
  0xd9   :  { %1530 = vmatprep.subr.bf16.mxu1 %v3149_v7 }
 0x16d   :  { %v531_v13 = vpop.f32.mrb[0].mxu0 }
 0x16e   :  { %v532_v15 = vadd.f32 %v531_v13, %v169_v10  ;;  %v533_v16 = vpop.f32.mrb[1].mxu0  ;;  %v574_v51 = vpop.f32.mrb[0].mxu1  ;;  %v3177_v10 = vld [vmem:[#allocation8 + $0x2a8] ss:$16 sps:$4 sm:$0xff]   ;;  %v3182_v13 = vld [vmem:[#allocation8 + $0x2c4] ss:$16 sps:$4 sm:$0xff]  }
 0x16f   :  { %v534_v17 = vadd.f32 %v533_v16, %v170_v11  ;;  %v535_v18 = vpop.f32.mrb[2].mxu0  ;;  %v575_v55 = vadd.f32 %v574_v51, %v171_v46  ;;  %v576_v56 = vpop.f32.mrb[1].mxu1  ;;  %v3180_v16 = vld [vmem:[#allocation8 + $0x2c0] ss:$16 sps:$4 sm:$0xff]   ;;  %v3230_v46 = vld [vmem:[#allocation8 + $0x3c4] ss:$16 sps:$4 sm:$0xff]  }
 0x170   :  { %v591_v19 = vmul.f32 0.2, %v532_v15  ;;  %v536_v20 = vadd.f32 %v535_v18, %v173_v12  ;;  %v537_v21 = vpop.f32.mrb[3].mxu0  ;;  %vm583_vm0 = vcmp.gt.f32.partialorder %v532_v15, 0.0  ;;  %v577_v58 = vadd.f32 %v576_v56, %v172_v47  ;;  %v578_v59 = vpop.f32.mrb[2].mxu1 }
 0x171   :  { %v592_v22 = vmul.f32 0.2, %v534_v17  ;;  %v538_v23 = vadd.f32 %v537_v21, %v174_v14  ;;  %vm584_vm1 = vcmp.gt.f32.partialorder %v534_v17, 0.0  ;;  %vm585_vm4 = vcmp.gt.f32.partialorder %v575_v55, 0.0  ;;  %v580_v63 = vpop.f32.mrb[3].mxu1 }
 0x172   :  { %vm587_vm2 = vcmp.gt.f32.partialorder %v536_v20, 0.0  ;;  %v595_v24 = vmul.f32 0.2, %v536_v20  ;;  %v599_v26 = vsel %vm583_vm0, %v532_v15, %v591_v19  ;;  %v593_v61 = vmul.f32 0.2, %v575_v55 }
 0x173   :  { %vm588_vm3 = vcmp.gt.f32.partialorder %v538_v23, 0.0  ;;  %v596_v25 = vmul.f32 0.2, %v538_v23  ;;  %v600_v29 = vsel %vm584_vm1, %v534_v17, %v592_v22  ;;  %v579_v62 = vadd.f32 %v578_v59, %v175_v48  ;;  %v3185_v14 = vld [vmem:[#allocation8 + $0x2cc] ss:$16 sps:$4 sm:$0xff]  }
 0x174   :  { %v603_v27 = vsel %vm587_vm2, %v536_v20, %v595_v24  ;;  %vm586_vm5 = vcmp.gt.f32.partialorder %v577_v58, 0.0  ;;  %v594_v1 = vmul.f32 0.2, %v577_v58  ;;  %v581_v2 = vadd.f32 %v580_v63, %v176_v52  ;;  %v3183_v17 = vld [vmem:[#allocation8 + $0x2c8] ss:$16 sps:$4 sm:$0xff]  }
 0x175   :  { %v607_v28 = vpack.c.bf16 %v603_v27, %v599_v26  ;;  %v604_v30 = vsel %vm588_vm3, %v538_v23, %v596_v25  ;;  %v601_v4 = vsel %vm585_vm4, %v575_v55, %v593_v61  ;;  %vm589_vm6 = vcmp.gt.f32.partialorder %v579_v62, 0.0  ;;  %v3188_v18 = vld [vmem:[#allocation8 + $0x2e4] ss:$16 sps:$4 sm:$0xff]   ;;  %v3191_v19 = vld [vmem:[#allocation8 + $0x2ec] ss:$16 sps:$4 sm:$0xff]  }
 0x176   :  { %v608_v31 = vpack.c.bf16 %v604_v30, %v600_v29  ;;  %v597_v5 = vmul.f32 0.2, %v579_v62  ;;  %vm590_vm7 = vcmp.gt.f32.partialorder %v581_v2, 0.0  ;;  %v598_v6 = vmul.f32 0.2, %v581_v2 }
 0x177   :  { %v602_v7 = vsel %vm586_vm5, %v577_v58, %v594_v1  ;;  %v3186_v20 = vld [vmem:[#allocation8 + $0x2e0] ss:$16 sps:$4 sm:$0xff]   ;;  %v3189_v21 = vld [vmem:[#allocation8 + $0x2e8] ss:$16 sps:$4 sm:$0xff]   ;;  %v3194_v22 = vld [vmem:[#allocation8 + $0x304] ss:$16 sps:$4 sm:$0xff]  }
 0x178   :  { %1433 = vmatprep.mubr.bf16.mxu0 %v608_v31  ;;  %1519 = vmatprep.mubr.bf16.mxu1 %v608_v31  ;;  %v605_v8 = vsel %vm589_vm6, %v579_v62, %v597_v5  ;;  %v606_v12 = vsel %vm590_vm7, %v581_v2, %v598_v6  ;;  %v3197_v23 = vld [vmem:[#allocation8 + $0x30c] ss:$16 sps:$4 sm:$0xff]   ;;  %v3192_v24 = vld [vmem:[#allocation8 + $0x300] ss:$16 sps:$4 sm:$0xff]   ;;  %v3195_v25 = vld [vmem:[#allocation8 + $0x308] ss:$16 sps:$4 sm:$0xff]  }
 0x179   :  { %1434 = vmatmul.mubr.bf16.vlgmr.msra.gmra.mrb[4].mxu0 %v607_v28  ;;  %1520 = vmatmul.mubr.bf16.vlgmr.msra.gmra.mrb[4].mxu1 %v607_v28  ;;  %v3711_v11 = vpack.c.bf16 %v605_v8, %v601_v4  ;;  %v610_v15 = vpack.c.bf16 %v606_v12, %v602_v7  ;;  %v3200_v26 = vld [vmem:[#allocation8 + $0x324] ss:$16 sps:$4 sm:$0xff]   ;;  %v3203_v27 = vld [vmem:[#allocation8 + $0x32c] ss:$16 sps:$4 sm:$0xff]   ;;  %v3198_v28 = vld [vmem:[#allocation8 + $0x320] ss:$16 sps:$4 sm:$0xff]  }
 0x17a   :  { %1445 = vmatpush1.bf16.msra.mxu0 %v3144_v32  ;;  %1531 = vmatpush1.bf16.msra.mxu1 %v3147_v33  ;;  %v3201_v29 = vld [vmem:[#allocation8 + $0x328] ss:$16 sps:$4 sm:$0xff]   ;;  %v3206_v30 = vld [vmem:[#allocation8 + $0x344] ss:$16 sps:$4 sm:$0xff]   ;;  %v3209_v31 = vld [vmem:[#allocation8 + $0x34c] ss:$16 sps:$4 sm:$0xff]  }
 0x17b   :  { %1446 = vmatprep.subr.bf16.mxu0 %v3152_v34  ;;  %1532 = vmatprep.subr.bf16.mxu1 %v3155_v35  ;;  %v3204_v32 = vld [vmem:[#allocation8 + $0x340] ss:$16 sps:$4 sm:$0xff]   ;;  %v3207_v33 = vld [vmem:[#allocation8 + $0x348] ss:$16 sps:$4 sm:$0xff]   ;;  %v3212_v34 = vld [vmem:[#allocation8 + $0x364] ss:$16 sps:$4 sm:$0xff]  }
 0x17c   :  { %1476 = vmatprep.mubr.bf16.mxu0 %v610_v15  ;;  %1562 = vmatprep.mubr.bf16.mxu1 %v610_v15  ;;  %v3215_v35 = vld [vmem:[#allocation8 + $0x36c] ss:$16 sps:$4 sm:$0xff]   ;;  %v3228_v48 = vld [vmem:[#allocation8 + $0x3c0] ss:$16 sps:$4 sm:$0xff]   ;;  %v3248_v58 = vld [vmem:[#allocation10 + $0x24] ss:$16 sps:$4 sm:$0xff]  }
 0x17d   :  { %v3233_v47 = vld [vmem:[#allocation8 + $0x3cc] ss:$16 sps:$4 sm:$0xff]   ;;  %v3234_v52 = vld [vmem:[#allocation8 + $0x3e0] ss:$16 sps:$4 sm:$0xff]   ;;  %v3249_v61 = vld [vmem:[#allocation10 + $0x28] ss:$16 sps:$4 sm:$0xff]  }
 0x17e   :  { %1447 = vmatpush1.bf16.msra.mxu0 %v3150_v36  ;;  %1533 = vmatpush1.bf16.msra.mxu1 %v3153_v37  ;;  %v3210_v36 = vld [vmem:[#allocation8 + $0x360] ss:$16 sps:$4 sm:$0xff]   ;;  %v3213_v37 = vld [vmem:[#allocation8 + $0x368] ss:$16 sps:$4 sm:$0xff]   ;;  %v3239_v51 = vld [vmem:[#allocation8 + $0x3ec] ss:$16 sps:$4 sm:$0xff]  }
 0x17f   :  { %1448 = vmatprep.subr.bf16.mxu0 %v3158_v38  ;;  %1534 = vmatprep.subr.bf16.mxu1 %v3161_v39  ;;  %v3218_v38 = vld [vmem:[#allocation8 + $0x384] ss:$16 sps:$4 sm:$0xff]   ;;  %v3221_v39 = vld [vmem:[#allocation8 + $0x38c] ss:$16 sps:$4 sm:$0xff]   ;;  %v3240_v56 = vld [vmem:[#allocation10] ss:$16 sps:$4 sm:$0xff]  }
 0x180   :  { %v3245_v55 = vld [vmem:[#allocation10 + $0xc] ss:$16 sps:$4 sm:$0xff]   ;;  %v3254_v62 = vld [vmem:[#allocation10 + $0x44] ss:$16 sps:$4 sm:$0xff]   ;;  %v3255_v1 = vld [vmem:[#allocation10 + $0x48] ss:$16 sps:$4 sm:$0xff]  }
 0x181   :  { %v3251_v59 = vld [vmem:[#allocation10 + $0x2c] ss:$16 sps:$4 sm:$0xff]   ;;  %v3260_v2 = vld [vmem:[#allocation10 + $0x64] ss:$16 sps:$4 sm:$0xff]   ;;  %v3258_v4 = vld [vmem:[#allocation10 + $0x60] ss:$16 sps:$4 sm:$0xff]  }
 0x182   :  { %1449 = vmatpush1.bf16.msra.mxu0 %v3156_v41  ;;  %1535 = vmatpush1.bf16.msra.mxu1 %v3159_v42  ;;  %v3219_v41 = vld [vmem:[#allocation8 + $0x388] ss:$16 sps:$4 sm:$0xff]   ;;  %v3224_v42 = vld [vmem:[#allocation8 + $0x3a4] ss:$16 sps:$4 sm:$0xff]   ;;  %v3257_v63 = vld [vmem:[#allocation10 + $0x4c] ss:$16 sps:$4 sm:$0xff]  }
 0x183   :  { %1450 = vmatprep.subr.bf16.mxu0 %v3164_v44  ;;  %1536 = vmatprep.subr.bf16.mxu1 %v3167_v45  ;;  %v3222_v44 = vld [vmem:[#allocation8 + $0x3a0] ss:$16 sps:$4 sm:$0xff]   ;;  %v3225_v45 = vld [vmem:[#allocation8 + $0x3a8] ss:$16 sps:$4 sm:$0xff]   ;;  %v3266_v6 = vld [vmem:[#allocation10 + $0x84] ss:$16 sps:$4 sm:$0xff]  }
 0x184   :  { %v3261_v5 = vld [vmem:[#allocation10 + $0x68] ss:$16 sps:$4 sm:$0xff]   ;;  %v3269_v7 = vld [vmem:[#allocation10 + $0x8c] ss:$16 sps:$4 sm:$0xff]   ;;  %v3264_v8 = vld [vmem:[#allocation10 + $0x80] ss:$16 sps:$4 sm:$0xff]  }
 0x185   :  { %v3270_v12 = vld [vmem:[#allocation10 + $0xa0] ss:$16 sps:$4 sm:$0xff]   ;;  %v3281_v15 = vld [vmem:[#allocation10 + $0xcc] ss:$16 sps:$4 sm:$0xff]  }
 0x186   :  { %1451 = vmatpush1.bf16.msra.mxu0 %v3162_v49  ;;  %1537 = vmatpush1.bf16.msra.mxu1 %v3165_v50  ;;  %v3231_v49 = vld [vmem:[#allocation8 + $0x3c8] ss:$16 sps:$4 sm:$0xff]   ;;  %v3236_v50 = vld [vmem:[#allocation8 + $0x3e4] ss:$16 sps:$4 sm:$0xff]  }
 0x187   :  { %1452 = vmatprep.subr.bf16.mxu0 %v3170_v53  ;;  %1538 = vmatprep.subr.bf16.mxu1 %v3173_v54  ;;  %v3237_v53 = vld [vmem:[#allocation8 + $0x3e8] ss:$16 sps:$4 sm:$0xff]   ;;  %v3242_v54 = vld [vmem:[#allocation10 + $0x4] ss:$16 sps:$4 sm:$0xff]  }
 0x18a   :  { %1453 = vmatpush1.bf16.msra.mxu0 %v3168_v57  ;;  %1539 = vmatpush1.bf16.msra.mxu1 %v3171_v60  ;;  %v3243_v57 = vld [vmem:[#allocation10 + $0x8] ss:$16 sps:$4 sm:$0xff]   ;;  %v3246_v60 = vld [vmem:[#allocation10 + $0x20] ss:$16 sps:$4 sm:$0xff]  }
 0x18b   :  { %1454 = vmatprep.subr.bf16.mxu0 %v3176_v0  ;;  %1540 = vmatprep.subr.bf16.mxu1 %v3179_v3  ;;  %v3252_v0 = vld [vmem:[#allocation10 + $0x40] ss:$16 sps:$4 sm:$0xff]   ;;  %v3263_v3 = vld [vmem:[#allocation10 + $0x6c] ss:$16 sps:$4 sm:$0xff]  }
 0x18e   :  { %1455 = vmatpush1.bf16.msra.mxu0 %v3174_v9  ;;  %1541 = vmatpush1.bf16.msra.mxu1 %v3177_v10  ;;  %v3267_v9 = vld [vmem:[#allocation10 + $0x88] ss:$16 sps:$4 sm:$0xff]   ;;  %v3272_v10 = vld [vmem:[#allocation10 + $0xa4] ss:$16 sps:$4 sm:$0xff]  }
 0x18f   :  { %1456 = vmatprep.subr.bf16.mxu0 %v3182_v13  ;;  %1542 = vmatprep.subr.bf16.mxu1 %v3185_v14  ;;  %v3273_v13 = vld [vmem:[#allocation10 + $0xa8] ss:$16 sps:$4 sm:$0xff]   ;;  %v3278_v14 = vld [vmem:[#allocation10 + $0xc4] ss:$16 sps:$4 sm:$0xff]  }
 0x192   :  { %1457 = vmatpush1.bf16.msra.mxu0 %v3180_v16  ;;  %1543 = vmatpush1.bf16.msra.mxu1 %v3183_v17  ;;  %v3276_v16 = vld [vmem:[#allocation10 + $0xc0] ss:$16 sps:$4 sm:$0xff]   ;;  %v3279_v17 = vld [vmem:[#allocation10 + $0xc8] ss:$16 sps:$4 sm:$0xff]  }
 0x193   :  { %1458 = vmatprep.subr.bf16.mxu0 %v3188_v18  ;;  %1544 = vmatprep.subr.bf16.mxu1 %v3191_v19  ;;  %v3284_v18 = vld [vmem:[#allocation10 + $0xe4] ss:$16 sps:$4 sm:$0xff]   ;;  %v3287_v19 = vld [vmem:[#allocation10 + $0xec] ss:$16 sps:$4 sm:$0xff]  }
 0x196   :  { %1459 = vmatpush1.bf16.msra.mxu0 %v3186_v20  ;;  %1545 = vmatpush1.bf16.msra.mxu1 %v3189_v21  ;;  %v3282_v20 = vld [vmem:[#allocation10 + $0xe0] ss:$16 sps:$4 sm:$0xff]   ;;  %v3285_v21 = vld [vmem:[#allocation10 + $0xe8] ss:$16 sps:$4 sm:$0xff]  }
 0x197   :  { %1460 = vmatprep.subr.bf16.mxu0 %v3194_v22  ;;  %1546 = vmatprep.subr.bf16.mxu1 %v3197_v23  ;;  %v3290_v22 = vld [vmem:[#allocation10 + $0x104] ss:$16 sps:$4 sm:$0xff]   ;;  %v3293_v23 = vld [vmem:[#allocation10 + $0x10c] ss:$16 sps:$4 sm:$0xff]  }
 0x19a   :  { %1461 = vmatpush1.bf16.msra.mxu0 %v3192_v24  ;;  %1547 = vmatpush1.bf16.msra.mxu1 %v3195_v25  ;;  %v3288_v24 = vld [vmem:[#allocation10 + $0x100] ss:$16 sps:$4 sm:$0xff]   ;;  %v3291_v25 = vld [vmem:[#allocation10 + $0x108] ss:$16 sps:$4 sm:$0xff]  }
 0x19b   :  { %1462 = vmatprep.subr.bf16.mxu0 %v3200_v26  ;;  %1548 = vmatprep.subr.bf16.mxu1 %v3203_v27  ;;  %v3296_v26 = vld [vmem:[#allocation10 + $0x124] ss:$16 sps:$4 sm:$0xff]   ;;  %v3299_v27 = vld [vmem:[#allocation10 + $0x12c] ss:$16 sps:$4 sm:$0xff]  }
 0x19e   :  { %1463 = vmatpush1.bf16.msra.mxu0 %v3198_v28  ;;  %1549 = vmatpush1.bf16.msra.mxu1 %v3201_v29  ;;  %v3294_v28 = vld [vmem:[#allocation10 + $0x120] ss:$16 sps:$4 sm:$0xff]   ;;  %v3297_v29 = vld [vmem:[#allocation10 + $0x128] ss:$16 sps:$4 sm:$0xff]  }
 0x19f   :  { %1464 = vmatprep.subr.bf16.mxu0 %v3206_v30  ;;  %1550 = vmatprep.subr.bf16.mxu1 %v3209_v31  ;;  %v3302_v30 = vld [vmem:[#allocation10 + $0x144] ss:$16 sps:$4 sm:$0xff]   ;;  %v3305_v31 = vld [vmem:[#allocation10 + $0x14c] ss:$16 sps:$4 sm:$0xff]  }
 0x1a2   :  { %1465 = vmatpush1.bf16.msra.mxu0 %v3204_v32  ;;  %1551 = vmatpush1.bf16.msra.mxu1 %v3207_v33  ;;  %v3300_v32 = vld [vmem:[#allocation10 + $0x140] ss:$16 sps:$4 sm:$0xff]   ;;  %v3303_v33 = vld [vmem:[#allocation10 + $0x148] ss:$16 sps:$4 sm:$0xff]  }
 0x1a3   :  { %1466 = vmatprep.subr.bf16.mxu0 %v3212_v34  ;;  %1552 = vmatprep.subr.bf16.mxu1 %v3215_v35  ;;  %v3308_v34 = vld [vmem:[#allocation10 + $0x164] ss:$16 sps:$4 sm:$0xff]   ;;  %v3311_v35 = vld [vmem:[#allocation10 + $0x16c] ss:$16 sps:$4 sm:$0xff]  }
 0x1a6   :  { %1467 = vmatpush1.bf16.msra.mxu0 %v3210_v36  ;;  %1553 = vmatpush1.bf16.msra.mxu1 %v3213_v37  ;;  %v3306_v36 = vld [vmem:[#allocation10 + $0x160] ss:$16 sps:$4 sm:$0xff]   ;;  %v3309_v37 = vld [vmem:[#allocation10 + $0x168] ss:$16 sps:$4 sm:$0xff]  }
 0x1a7   :  { %1468 = vmatprep.subr.bf16.mxu0 %v3218_v38  ;;  %1554 = vmatprep.subr.bf16.mxu1 %v3221_v39  ;;  %v3314_v38 = vld [vmem:[#allocation10 + $0x184] ss:$16 sps:$4 sm:$0xff]   ;;  %v3317_v39 = vld [vmem:[#allocation10 + $0x18c] ss:$16 sps:$4 sm:$0xff]  }
 0x1aa   :  { %1469 = vmatpush1.bf16.msra.mxu0 %v3216_v40  ;;  %1555 = vmatpush1.bf16.msra.mxu1 %v3219_v41  ;;  %v3312_v40 = vld [vmem:[#allocation10 + $0x180] ss:$16 sps:$4 sm:$0xff]   ;;  %v3315_v41 = vld [vmem:[#allocation10 + $0x188] ss:$16 sps:$4 sm:$0xff]  }
 0x1ab   :  { %1470 = vmatprep.subr.bf16.mxu0 %v3224_v42  ;;  %1556 = vmatprep.subr.bf16.mxu1 %v3227_v43  ;;  %v3320_v42 = vld [vmem:[#allocation10 + $0x1a4] ss:$16 sps:$4 sm:$0xff]   ;;  %v3323_v43 = vld [vmem:[#allocation10 + $0x1ac] ss:$16 sps:$4 sm:$0xff]  }
 0x1ae   :  { %1471 = vmatpush1.bf16.msra.mxu0 %v3222_v44  ;;  %1557 = vmatpush1.bf16.msra.mxu1 %v3225_v45  ;;  %v3318_v44 = vld [vmem:[#allocation10 + $0x1a0] ss:$16 sps:$4 sm:$0xff]   ;;  %v3321_v45 = vld [vmem:[#allocation10 + $0x1a8] ss:$16 sps:$4 sm:$0xff]  }
 0x1af   :  { %1472 = vmatprep.subr.bf16.mxu0 %v3230_v46  ;;  %1558 = vmatprep.subr.bf16.mxu1 %v3233_v47  ;;  %v3326_v46 = vld [vmem:[#allocation10 + $0x1c4] ss:$16 sps:$4 sm:$0xff]   ;;  %v3329_v47 = vld [vmem:[#allocation10 + $0x1cc] ss:$16 sps:$4 sm:$0xff]  }
 0x1b2   :  { %1473 = vmatpush1.bf16.msra.mxu0 %v3228_v48  ;;  %1559 = vmatpush1.bf16.msra.mxu1 %v3231_v49  ;;  %v3324_v48 = vld [vmem:[#allocation10 + $0x1c0] ss:$16 sps:$4 sm:$0xff]   ;;  %v3327_v49 = vld [vmem:[#allocation10 + $0x1c8] ss:$16 sps:$4 sm:$0xff]  }
 0x1b3   :  { %1474 = vmatprep.subr.bf16.mxu0 %v3236_v50  ;;  %1560 = vmatprep.subr.bf16.mxu1 %v3239_v51  ;;  %v3332_v50 = vld [vmem:[#allocation10 + $0x1e4] ss:$16 sps:$4 sm:$0xff]   ;;  %v3335_v51 = vld [vmem:[#allocation10 + $0x1ec] ss:$16 sps:$4 sm:$0xff]  }
 0x1b6   :  { %1475 = vmatpush1.bf16.msra.mxu0 %v3234_v52  ;;  %1561 = vmatpush1.bf16.msra.mxu1 %v3237_v53  ;;  %v3330_v52 = vld [vmem:[#allocation10 + $0x1e0] ss:$16 sps:$4 sm:$0xff]   ;;  %v3333_v53 = vld [vmem:[#allocation10 + $0x1e8] ss:$16 sps:$4 sm:$0xff]  }
 0x1b7   :  { %2391 = vmatprep.subr.bf16.mxu0 %v3242_v54  ;;  %2477 = vmatprep.subr.bf16.mxu1 %v3245_v55  ;;  %v3338_v54 = vld [vmem:[#allocation10 + $0x204] ss:$16 sps:$4 sm:$0xff]   ;;  %v3341_v55 = vld [vmem:[#allocation10 + $0x20c] ss:$16 sps:$4 sm:$0xff]  }
 0x1b9   :  { %1477 = vmatmul.mubr.bf16.vlgmr.msra.gmra.mrb[4].mxu0 %v3711_v11  ;;  %1563 = vmatmul.mubr.bf16.vlgmr.msra.gmra.mrb[4].mxu1 %v3711_v11  ;;  %v3275_v11 = vld [vmem:[#allocation10 + $0xac] ss:$16 sps:$4 sm:$0xff]  }
 0x1ba   :  { %2392 = vmatpush1.bf16.msra.mxu0 %v3240_v56  ;;  %2478 = vmatpush1.bf16.msra.mxu1 %v3243_v57  ;;  %v741_v56 = vlaneseq }
 0x1bb   :  { %2393 = vmatprep.subr.bf16.mxu0 %v3248_v58  ;;  %2479 = vmatprep.subr.bf16.mxu1 %v3251_v59 }
 0x1bc   :  { %v3715_v57 = vshrl.u32 %v741_v56, 7  ;;  %v3363_v56 = vld [vmem:[#allocation10 + $0x288] ss:$16 sps:$4 sm:$0xff]  }
 0x1be   :  { %2394 = vmatpush1.bf16.msra.mxu0 %v3246_v60  ;;  %2480 = vmatpush1.bf16.msra.mxu1 %v3249_v61  ;;  %v743_v58 = vsub.s32 0, %v3715_v57  ;;  %v751_v59 = vsub.s32 2, %v3715_v57  ;;  %v739_v60 = vld [vmem:[%s3765_s4] sm:$0xf]  ;;  %v747_v61 = vsub.s32 1, %v3715_v57 }
 0x1bf   :  { %2395 = vmatprep.subr.bf16.mxu0 %v3254_v62  ;;  %2481 = vmatprep.subr.bf16.mxu1 %v3257_v63  ;;  %v755_v62 = vsub.s32 3, %v3715_v57 }
 0x1c0   :  { %v744_v63 = vrot.slane %v739_v60, %v743_v58 }
 0x1c2   :  { %2396 = vmatpush1.bf16.msra.mxu0 %v3252_v0  ;;  %2482 = vmatpush1.bf16.msra.mxu1 %v3255_v1  ;;  %v752_v0 = vrot.slane %v739_v60, %v751_v59  ;;  %v748_v1 = vrot.slane %v739_v60, %v747_v61 }
 0x1c3   :  { %2397 = vmatprep.subr.bf16.mxu0 %v3260_v2  ;;  %2483 = vmatprep.subr.bf16.mxu1 %v3263_v3  ;;  %v756_v2 = vrot.slane %v739_v60, %v755_v62  ;;  %v3368_v60 = vld [vmem:[#allocation10 + $0x2a4] ss:$16 sps:$4 sm:$0xff]  }
 0x1c6   :  { %2398 = vmatpush1.bf16.msra.mxu0 %v3258_v4  ;;  %2484 = vmatpush1.bf16.msra.mxu1 %v3261_v5 }
 0x1c7   :  { %2399 = vmatprep.subr.bf16.mxu0 %v3266_v6  ;;  %2485 = vmatprep.subr.bf16.mxu1 %v3269_v7 }
 0x1ca   :  { %2400 = vmatpush1.bf16.msra.mxu0 %v3264_v8  ;;  %2486 = vmatpush1.bf16.msra.mxu1 %v3267_v9 }
 0x1cb   :  { %2401 = vmatprep.subr.bf16.mxu0 %v3272_v10  ;;  %2487 = vmatprep.subr.bf16.mxu1 %v3275_v11 }
 0x1ce   :  { %2402 = vmatpush1.bf16.msra.mxu0 %v3270_v12  ;;  %2488 = vmatpush1.bf16.msra.mxu1 %v3273_v13 }
 0x1cf   :  { %2403 = vmatprep.subr.bf16.mxu0 %v3278_v14  ;;  %2489 = vmatprep.subr.bf16.mxu1 %v3281_v15 }
 0x1d2   :  { %2404 = vmatpush1.bf16.msra.mxu0 %v3276_v16  ;;  %2490 = vmatpush1.bf16.msra.mxu1 %v3279_v17 }
 0x1d3   :  { %2405 = vmatprep.subr.bf16.mxu0 %v3284_v18  ;;  %2491 = vmatprep.subr.bf16.mxu1 %v3287_v19 }
 0x1d6   :  { %2406 = vmatpush1.bf16.msra.mxu0 %v3282_v20  ;;  %2492 = vmatpush1.bf16.msra.mxu1 %v3285_v21 }
 0x1d7   :  { %2407 = vmatprep.subr.bf16.mxu0 %v3290_v22  ;;  %2493 = vmatprep.subr.bf16.mxu1 %v3293_v23 }
 0x1da   :  { %2408 = vmatpush1.bf16.msra.mxu0 %v3288_v24  ;;  %2494 = vmatpush1.bf16.msra.mxu1 %v3291_v25 }
 0x1db   :  { %2409 = vmatprep.subr.bf16.mxu0 %v3296_v26  ;;  %2495 = vmatprep.subr.bf16.mxu1 %v3299_v27 }
 0x1de   :  { %2410 = vmatpush1.bf16.msra.mxu0 %v3294_v28  ;;  %2496 = vmatpush1.bf16.msra.mxu1 %v3297_v29 }
 0x1df   :  { %2411 = vmatprep.subr.bf16.mxu0 %v3302_v30  ;;  %2497 = vmatprep.subr.bf16.mxu1 %v3305_v31 }
 0x1e2   :  { %2412 = vmatpush1.bf16.msra.mxu0 %v3300_v32  ;;  %2498 = vmatpush1.bf16.msra.mxu1 %v3303_v33 }
 0x1e3   :  { %2413 = vmatprep.subr.bf16.mxu0 %v3308_v34  ;;  %2499 = vmatprep.subr.bf16.mxu1 %v3311_v35 }
 0x1e6   :  { %2414 = vmatpush1.bf16.msra.mxu0 %v3306_v36  ;;  %2500 = vmatpush1.bf16.msra.mxu1 %v3309_v37 }
 0x1e7   :  { %2415 = vmatprep.subr.bf16.mxu0 %v3314_v38  ;;  %2501 = vmatprep.subr.bf16.mxu1 %v3317_v39  ;;  %v3336_v38 = vld [vmem:[#allocation10 + $0x200] ss:$16 sps:$4 sm:$0xff]   ;;  %v3339_v39 = vld [vmem:[#allocation10 + $0x208] ss:$16 sps:$4 sm:$0xff]  }
 0x1ea   :  { %2416 = vmatpush1.bf16.msra.mxu0 %v3312_v40  ;;  %2502 = vmatpush1.bf16.msra.mxu1 %v3315_v41  ;;  %v3344_v41 = vld [vmem:[#allocation10 + $0x224] ss:$16 sps:$4 sm:$0xff]  }
 0x1eb   :  { %2417 = vmatprep.subr.bf16.mxu0 %v3320_v42  ;;  %2503 = vmatprep.subr.bf16.mxu1 %v3323_v43  ;;  %v3347_v42 = vld [vmem:[#allocation10 + $0x22c] ss:$16 sps:$4 sm:$0xff]   ;;  %v3342_v43 = vld [vmem:[#allocation10 + $0x220] ss:$16 sps:$4 sm:$0xff]  }
 0x1ee   :  { %2418 = vmatpush1.bf16.msra.mxu0 %v3318_v44  ;;  %2504 = vmatpush1.bf16.msra.mxu1 %v3321_v45  ;;  %v3345_v44 = vld [vmem:[#allocation10 + $0x228] ss:$16 sps:$4 sm:$0xff]   ;;  %v3350_v45 = vld [vmem:[#allocation10 + $0x244] ss:$16 sps:$4 sm:$0xff]  }
 0x1ef   :  { %2419 = vmatprep.subr.bf16.mxu0 %v3326_v46  ;;  %2505 = vmatprep.subr.bf16.mxu1 %v3329_v47  ;;  %v3353_v46 = vld [vmem:[#allocation10 + $0x24c] ss:$16 sps:$4 sm:$0xff]   ;;  %v3348_v47 = vld [vmem:[#allocation10 + $0x240] ss:$16 sps:$4 sm:$0xff]  }
 0x1f2   :  { %2420 = vmatpush1.bf16.msra.mxu0 %v3324_v48  ;;  %2506 = vmatpush1.bf16.msra.mxu1 %v3327_v49  ;;  %v3351_v48 = vld [vmem:[#allocation10 + $0x248] ss:$16 sps:$4 sm:$0xff]   ;;  %v3356_v49 = vld [vmem:[#allocation10 + $0x264] ss:$16 sps:$4 sm:$0xff]  }
 0x1f3   :  { %2421 = vmatprep.subr.bf16.mxu0 %v3332_v50  ;;  %2507 = vmatprep.subr.bf16.mxu1 %v3335_v51  ;;  %v3359_v50 = vld [vmem:[#allocation10 + $0x26c] ss:$16 sps:$4 sm:$0xff]   ;;  %v3354_v51 = vld [vmem:[#allocation10 + $0x260] ss:$16 sps:$4 sm:$0xff]  }
 0x1f6   :  { %2422 = vmatpush1.bf16.msra.mxu0 %v3330_v52  ;;  %2508 = vmatpush1.bf16.msra.mxu1 %v3333_v53  ;;  %v3357_v52 = vld [vmem:[#allocation10 + $0x268] ss:$16 sps:$4 sm:$0xff]   ;;  %v3362_v53 = vld [vmem:[#allocation10 + $0x284] ss:$16 sps:$4 sm:$0xff]  }
 0x1f7   :  { %2434 = vmatprep.subr.bf16.mxu0 %v3338_v54  ;;  %2520 = vmatprep.subr.bf16.mxu1 %v3341_v55  ;;  %v3365_v54 = vld [vmem:[#allocation10 + $0x28c] ss:$16 sps:$4 sm:$0xff]   ;;  %v3360_v55 = vld [vmem:[#allocation10 + $0x280] ss:$16 sps:$4 sm:$0xff]  }
 0x28c   :  { %v1478_v3 = vpop.f32.mrb[4].mxu0  ;;  %v1564_v4 = vpop.f32.mrb[4].mxu1 }
 0x28d   :  { %v2910_v5 = vadd.f32 %v1478_v3, %v744_v63  ;;  %v2914_v6 = vadd.f32 %v1564_v4, %v752_v0  ;;  %v1480_v7 = vpop.f32.mrb[5].mxu0  ;;  %v1566_v8 = vpop.f32.mrb[5].mxu1  ;;  %v3377_v3 = vld [vmem:[#allocation10 + $0x2cc] ss:$16 sps:$4 sm:$0xff]   ;;  %v3372_v4 = vld [vmem:[#allocation10 + $0x2c0] ss:$16 sps:$4 sm:$0xff]  }
 0x28e   :  { %v2911_v9 = vadd.f32 %v1480_v7, %v748_v1  ;;  %v2915_v10 = vadd.f32 %v1566_v8, %v756_v2  ;;  %v1482_v11 = vpop.f32.mrb[6].mxu0  ;;  %v1568_v12 = vpop.f32.mrb[6].mxu1  ;;  %v3383_v7 = vld [vmem:[#allocation10 + $0x2ec] ss:$16 sps:$4 sm:$0xff]   ;;  %v3378_v8 = vld [vmem:[#allocation10 + $0x2e0] ss:$16 sps:$4 sm:$0xff]  }
 0x28f   :  { %vm1573_vm8 = vcmp.gt.f32.partialorder %v2910_v5, 0.0  ;;  %v1581_v13 = vmul.f32 0.2, %v2910_v5  ;;  %vm1575_vm9 = vcmp.gt.f32.partialorder %v2914_v6, 0.0  ;;  %v1583_v14 = vmul.f32 0.2, %v2914_v6 }
 0x290   :  { %vm1574_vm10 = vcmp.gt.f32.partialorder %v2911_v9, 0.0  ;;  %v1582_v15 = vmul.f32 0.2, %v2911_v9  ;;  %vm1576_vm11 = vcmp.gt.f32.partialorder %v2915_v10, 0.0  ;;  %v1584_v16 = vmul.f32 0.2, %v2915_v10 }
 0x291   :  { %v2912_v17 = vadd.f32 %v1482_v11, %v744_v63  ;;  %v2916_v18 = vadd.f32 %v1568_v12, %v752_v0  ;;  %v1484_v19 = vpop.f32.mrb[7].mxu0  ;;  %v1570_v20 = vpop.f32.mrb[7].mxu1  ;;  %v1589_v21 = vsel %vm1573_vm8, %v2910_v5, %v1581_v13  ;;  %v1591_v22 = vsel %vm1575_vm9, %v2914_v6, %v1583_v14  ;;  %v3371_v63 = vld [vmem:[#allocation10 + $0x2ac] ss:$16 sps:$4 sm:$0xff]   ;;  %v3366_v0 = vld [vmem:[#allocation10 + $0x2a0] ss:$16 sps:$4 sm:$0xff]  }
 0x292   :  { %v2913_v23 = vadd.f32 %v1484_v19, %v748_v1  ;;  %v2917_v24 = vadd.f32 %v1570_v20, %v756_v2  ;;  %v1590_v31 = vsel %vm1574_vm10, %v2911_v9, %v1582_v15  ;;  %v1592_v32 = vsel %vm1576_vm11, %v2915_v10, %v1584_v16  ;;  %v3369_v1 = vld [vmem:[#allocation10 + $0x2a8] ss:$16 sps:$4 sm:$0xff]   ;;  %v3374_v2 = vld [vmem:[#allocation10 + $0x2c4] ss:$16 sps:$4 sm:$0xff]   ;;  %v3389_v11 = vld [vmem:[#allocation10 + $0x30c] ss:$16 sps:$4 sm:$0xff]  }
 0x293   :  { %vm1577_vm12 = vcmp.gt.f32.partialorder %v2912_v17, 0.0  ;;  %v1585_v25 = vmul.f32 0.2, %v2912_v17  ;;  %vm1579_vm13 = vcmp.gt.f32.partialorder %v2916_v18, 0.0  ;;  %v1587_v26 = vmul.f32 0.2, %v2916_v18 }
 0x294   :  { %vm1578_vm14 = vcmp.gt.f32.partialorder %v2913_v23, 0.0  ;;  %v1586_v27 = vmul.f32 0.2, %v2913_v23  ;;  %vm1580_vm15 = vcmp.gt.f32.partialorder %v2917_v24, 0.0  ;;  %v1588_v28 = vmul.f32 0.2, %v2917_v24 }
 0x295   :  { %v1593_v29 = vsel %vm1577_vm12, %v2912_v17, %v1585_v25  ;;  %v1595_v30 = vsel %vm1579_vm13, %v2916_v18, %v1587_v26  ;;  %v3375_v5 = vld [vmem:[#allocation10 + $0x2c8] ss:$16 sps:$4 sm:$0xff]   ;;  %v3380_v6 = vld [vmem:[#allocation10 + $0x2e4] ss:$16 sps:$4 sm:$0xff]   ;;  %v3384_v12 = vld [vmem:[#allocation10 + $0x300] ss:$16 sps:$4 sm:$0xff]  }
 0x296   :  { %v1597_v33 = vpack.c.bf16 %v1593_v29, %v1589_v21  ;;  %v3734_v34 = vpack.c.bf16 %v1595_v30, %v1591_v22  ;;  %v1594_v35 = vsel %vm1578_vm14, %v2913_v23, %v1586_v27  ;;  %v1596_v36 = vsel %vm1580_vm15, %v2917_v24, %v1588_v28  ;;  %v3381_v9 = vld [vmem:[#allocation10 + $0x2e8] ss:$16 sps:$4 sm:$0xff]   ;;  %v3386_v10 = vld [vmem:[#allocation10 + $0x304] ss:$16 sps:$4 sm:$0xff]   ;;  %v3395_v15 = vld [vmem:[#allocation10 + $0x32c] ss:$16 sps:$4 sm:$0xff]  }
 0x297   :  { %v1598_v37 = vpack.c.bf16 %v1594_v35, %v1590_v31  ;;  %v1600_v40 = vpack.c.bf16 %v1596_v36, %v1592_v32  ;;  %v3387_v13 = vld [vmem:[#allocation10 + $0x308] ss:$16 sps:$4 sm:$0xff]   ;;  %v3392_v14 = vld [vmem:[#allocation10 + $0x324] ss:$16 sps:$4 sm:$0xff]   ;;  %v3390_v16 = vld [vmem:[#allocation10 + $0x320] ss:$16 sps:$4 sm:$0xff]  }
 0x298   :  { %v3393_v17 = vld [vmem:[#allocation10 + $0x328] ss:$16 sps:$4 sm:$0xff]   ;;  %v3398_v18 = vld [vmem:[#allocation10 + $0x344] ss:$16 sps:$4 sm:$0xff]   ;;  %v3401_v19 = vld [vmem:[#allocation10 + $0x34c] ss:$16 sps:$4 sm:$0xff]  }
 0x299   :  { %2423 = vmatprep.mubr.bf16.mxu0 %v1598_v37  ;;  %2509 = vmatprep.mubr.bf16.mxu1 %v1598_v37  ;;  %v3396_v20 = vld [vmem:[#allocation10 + $0x340] ss:$16 sps:$4 sm:$0xff]   ;;  %v3399_v21 = vld [vmem:[#allocation10 + $0x348] ss:$16 sps:$4 sm:$0xff]   ;;  %v3404_v22 = vld [vmem:[#allocation10 + $0x364] ss:$16 sps:$4 sm:$0xff]  }
 0x29a   :  { %2424 = vmatmul.mubr.bf16.vlgmr.msra.gmra.mrb[8].mxu0 %v1597_v33  ;;  %2510 = vmatmul.mubr.bf16.vlgmr.msra.gmra.mrb[8].mxu1 %v1597_v33  ;;  %v3407_v23 = vld [vmem:[#allocation10 + $0x36c] ss:$16 sps:$4 sm:$0xff]   ;;  %v3402_v24 = vld [vmem:[#allocation10 + $0x360] ss:$16 sps:$4 sm:$0xff]   ;;  %v3405_v25 = vld [vmem:[#allocation10 + $0x368] ss:$16 sps:$4 sm:$0xff]  }
 0x29b   :  { %2435 = vmatpush1.bf16.msra.mxu0 %v3336_v38  ;;  %2521 = vmatpush1.bf16.msra.mxu1 %v3339_v39  ;;  %v3410_v26 = vld [vmem:[#allocation10 + $0x384] ss:$16 sps:$4 sm:$0xff]   ;;  %v3413_v27 = vld [vmem:[#allocation10 + $0x38c] ss:$16 sps:$4 sm:$0xff]   ;;  %v3408_v28 = vld [vmem:[#allocation10 + $0x380] ss:$16 sps:$4 sm:$0xff]  }
 0x29c   :  { %2466 = vmatprep.mubr.bf16.mxu0 %v1600_v40  ;;  %2552 = vmatprep.mubr.bf16.mxu1 %v1600_v40  ;;  %v3411_v29 = vld [vmem:[#allocation10 + $0x388] ss:$16 sps:$4 sm:$0xff]   ;;  %v3416_v30 = vld [vmem:[#allocation10 + $0x3a4] ss:$16 sps:$4 sm:$0xff]   ;;  %v3419_v31 = vld [vmem:[#allocation10 + $0x3ac] ss:$16 sps:$4 sm:$0xff]  }
 0x29d   :  { %2436 = vmatprep.subr.bf16.mxu0 %v3344_v41  ;;  %2522 = vmatprep.subr.bf16.mxu1 %v3347_v42  ;;  %v3414_v32 = vld [vmem:[#allocation10 + $0x3a0] ss:$16 sps:$4 sm:$0xff]   ;;  %v3417_v33 = vld [vmem:[#allocation10 + $0x3a8] ss:$16 sps:$4 sm:$0xff]   ;;  %v3422_v35 = vld [vmem:[#allocation10 + $0x3c4] ss:$16 sps:$4 sm:$0xff]  }
 0x29e   :  { %v3425_v36 = vld [vmem:[#allocation10 + $0x3cc] ss:$16 sps:$4 sm:$0xff]   ;;  %v3420_v37 = vld [vmem:[#allocation10 + $0x3c0] ss:$16 sps:$4 sm:$0xff]   ;;  %v3423_v38 = vld [vmem:[#allocation10 + $0x3c8] ss:$16 sps:$4 sm:$0xff]  }
 0x29f   :  { %2437 = vmatpush1.bf16.msra.mxu0 %v3342_v43  ;;  %2523 = vmatpush1.bf16.msra.mxu1 %v3345_v44  ;;  %v3428_v39 = vld [vmem:[#allocation10 + $0x3e4] ss:$16 sps:$4 sm:$0xff]   ;;  %v3431_v40 = vld [vmem:[#allocation10 + $0x3ec] ss:$16 sps:$4 sm:$0xff]   ;;  %v3426_v41 = vld [vmem:[#allocation10 + $0x3e0] ss:$16 sps:$4 sm:$0xff]  }
 0x2a0   :  { %2438 = vmatprep.subr.bf16.mxu0 %v3350_v45  ;;  %2524 = vmatprep.subr.bf16.mxu1 %v3353_v46  ;;  %v3429_v42 = vld [vmem:[#allocation10 + $0x3e8] ss:$16 sps:$4 sm:$0xff]   ;;  %v1729_v43 = vld [vmem:[%s3767_s6] sm:$0xf]  ;;  %s3542_s6 = scalar_lea.vmem %s2577_s27, 1024 }
 0x2a1   :  { %v1734_v44 = vrot.slane %v1729_v43, %v743_v58  ;;  %v1742_v45 = vrot.slane %v1729_v43, %v751_v59  ;;  %v1738_v46 = vrot.slane %v1729_v43, %v747_v61  ;;  %p3543_p12 = scmp.ne.s32.totalorder %s2577_s27, %s3542_s6  ;;  %p3548_p0 = scmp.lt.s32.totalorder %s3542_s6, %s3542_s6 }
 0x2a3   :  { %2439 = vmatpush1.bf16.msra.mxu0 %v3348_v47  ;;  %2525 = vmatpush1.bf16.msra.mxu1 %v3351_v48  ;;  %v1746_v47 = vrot.slane %v1729_v43, %v755_v62  ;;  %p3549_p1 = por %p3548_p0, %p3547_p13 }
 0x2a4   :  { %2440 = vmatprep.subr.bf16.mxu0 %v3356_v49  ;;  %2526 = vmatprep.subr.bf16.mxu1 %v3359_v50 }
 0x2a5   :  { %p3550_p2 = pnand %p3549_p1, %p3543_p12 }
 0x2a7   :  { %2441 = vmatpush1.bf16.msra.mxu0 %v3354_v51  ;;  %2527 = vmatpush1.bf16.msra.mxu1 %v3357_v52 }
 0x2a8   :  { %2442 = vmatprep.subr.bf16.mxu0 %v3362_v53  ;;  %2528 = vmatprep.subr.bf16.mxu1 %v3365_v54 }
 0x2ab   :  { %2443 = vmatpush1.bf16.msra.mxu0 %v3360_v55  ;;  %2529 = vmatpush1.bf16.msra.mxu1 %v3363_v56 }
 0x2ac   :  { %2444 = vmatprep.subr.bf16.mxu0 %v3368_v60  ;;  %2530 = vmatprep.subr.bf16.mxu1 %v3371_v63 }
 0x2af   :  { %2445 = vmatpush1.bf16.msra.mxu0 %v3366_v0  ;;  %2531 = vmatpush1.bf16.msra.mxu1 %v3369_v1 }
 0x2b0   :  { %2446 = vmatprep.subr.bf16.mxu0 %v3374_v2  ;;  %2532 = vmatprep.subr.bf16.mxu1 %v3377_v3 }
 0x2b3   :  { %2447 = vmatpush1.bf16.msra.mxu0 %v3372_v4  ;;  %2533 = vmatpush1.bf16.msra.mxu1 %v3375_v5 }
 0x2b4   :  { %2448 = vmatprep.subr.bf16.mxu0 %v3380_v6  ;;  %2534 = vmatprep.subr.bf16.mxu1 %v3383_v7 }
 0x2b7   :  { %2449 = vmatpush1.bf16.msra.mxu0 %v3378_v8  ;;  %2535 = vmatpush1.bf16.msra.mxu1 %v3381_v9 }
 0x2b8   :  { %2450 = vmatprep.subr.bf16.mxu0 %v3386_v10  ;;  %2536 = vmatprep.subr.bf16.mxu1 %v3389_v11 }
 0x2bb   :  { %2451 = vmatpush1.bf16.msra.mxu0 %v3384_v12  ;;  %2537 = vmatpush1.bf16.msra.mxu1 %v3387_v13 }
 0x2bc   :  { %2452 = vmatprep.subr.bf16.mxu0 %v3392_v14  ;;  %2538 = vmatprep.subr.bf16.mxu1 %v3395_v15 }
 0x2bf   :  { %2453 = vmatpush1.bf16.msra.mxu0 %v3390_v16  ;;  %2539 = vmatpush1.bf16.msra.mxu1 %v3393_v17 }
 0x2c0   :  { %2454 = vmatprep.subr.bf16.mxu0 %v3398_v18  ;;  %2540 = vmatprep.subr.bf16.mxu1 %v3401_v19 }
 0x2c3   :  { %2455 = vmatpush1.bf16.msra.mxu0 %v3396_v20  ;;  %2541 = vmatpush1.bf16.msra.mxu1 %v3399_v21 }
 0x2c4   :  { %2456 = vmatprep.subr.bf16.mxu0 %v3404_v22  ;;  %2542 = vmatprep.subr.bf16.mxu1 %v3407_v23 }
 0x2c7   :  { %2457 = vmatpush1.bf16.msra.mxu0 %v3402_v24  ;;  %2543 = vmatpush1.bf16.msra.mxu1 %v3405_v25 }
 0x2c8   :  { %2458 = vmatprep.subr.bf16.mxu0 %v3410_v26  ;;  %2544 = vmatprep.subr.bf16.mxu1 %v3413_v27 }
 0x2cb   :  { %2459 = vmatpush1.bf16.msra.mxu0 %v3408_v28  ;;  %2545 = vmatpush1.bf16.msra.mxu1 %v3411_v29 }
 0x2cc   :  { %2460 = vmatprep.subr.bf16.mxu0 %v3416_v30  ;;  %2546 = vmatprep.subr.bf16.mxu1 %v3419_v31 }
 0x2cf   :  { %2461 = vmatpush1.bf16.msra.mxu0 %v3414_v32  ;;  %2547 = vmatpush1.bf16.msra.mxu1 %v3417_v33 }
 0x2d0   :  { %2462 = vmatprep.subr.bf16.mxu0 %v3422_v35  ;;  %2548 = vmatprep.subr.bf16.mxu1 %v3425_v36 }
 0x2d3   :  { %2463 = vmatpush1.bf16.msra.mxu0 %v3420_v37  ;;  %2549 = vmatpush1.bf16.msra.mxu1 %v3423_v38 }
 0x2d4   :  { %2464 = vmatprep.subr.bf16.mxu0 %v3428_v39  ;;  %2550 = vmatprep.subr.bf16.mxu1 %v3431_v40 }
 0x2d7   :  { %2465 = vmatpush1.bf16.msra.mxu0 %v3426_v41  ;;  %2551 = vmatpush1.bf16.msra.mxu1 %v3429_v42 }
 0x2da   :  { %2467 = vmatmul.mubr.bf16.vlgmr.msra.gmra.mrb[8].mxu0 %v3734_v34  ;;  %2553 = vmatmul.mubr.bf16.vlgmr.msra.gmra.mrb[8].mxu1 %v3734_v34 }
 0x3ad   :  { %v2468_v48 = vpop.f32.mrb[8].mxu0  ;;  %v2554_v49 = vpop.f32.mrb[8].mxu1 }
 0x3ae   :  { %v2918_v34 = vadd.f32 %v2468_v48, %v1734_v44  ;;  %v2922_v50 = vadd.f32 %v2554_v49, %v1742_v45  ;;  %v2470_v51 = vpop.f32.mrb[9].mxu0  ;;  %v2556_v52 = vpop.f32.mrb[9].mxu1 }
 0x3af   :  { %v2919_v53 = vadd.f32 %v2470_v51, %v1738_v46  ;;  %v2923_v54 = vadd.f32 %v2556_v52, %v1746_v47  ;;  %v2472_v58 = vpop.f32.mrb[10].mxu0  ;;  %v2558_v55 = vpop.f32.mrb[10].mxu1 }
 0x3b0   :  { %2563 = vst [vmem:[#allocation11] sm:$0xff] %v2918_v34  ;;  %2565 = vst [vmem:[#allocation11 + $0x10] sm:$0xff] %v2922_v50  ;;  %v2920_v59 = vadd.f32 %v2472_v58, %v1734_v44  ;;  %v2924_v56 = vadd.f32 %v2558_v55, %v1742_v45  ;;  %v2474_v61 = vpop.f32.mrb[11].mxu0  ;;  %v2560_v60 = vpop.f32.mrb[11].mxu1 }
 0x3b1   :  { %2564 = vst [vmem:[#allocation11 + $0x8] sm:$0xff] %v2919_v53  ;;  %2566 = vst [vmem:[#allocation11 + $0x18] sm:$0xff] %v2923_v54  ;;  %v2921_v57 = vadd.f32 %v2474_v61, %v1738_v46  ;;  %v2925_v62 = vadd.f32 %v2560_v60, %v1746_v47 }
 0x3b2   :  { %2567 = vst [vmem:[#allocation11 + $0x20] sm:$0xff] %v2920_v59  ;;  %2569 = vst [vmem:[#allocation11 + $0x30] sm:$0xff] %v2924_v56 }
 0x3b3   :  { %2568 = vst [vmem:[#allocation11 + $0x28] sm:$0xff] %v2921_v57  ;;  %2570 = vst [vmem:[#allocation11 + $0x38] sm:$0xff] %v2925_v62 }
 0x3b4   :  { %3553 = shalt.err (!%p3550_p2)
}
 0x3b5   :  { %s3554_s19 = scalar_lea.hbm %s3768_s7, 1024 }
 0x3b6   :  { %p3555_p3 = scmp.ne.s32.totalorder %s3768_s7, %s3554_s19  ;;  %p3558_p4 = scmp.lt.u32.totalorder %s3554_s19, %s3768_s7 }
 0x3b8   :  { %p3560_p5 = pnand %p3558_p4, %p3555_p3 }
 0x3ba   :  { %3563 = shalt.err (!%p3560_p5)
}
 0x3bb   :  { %s3580_s24 = smov 512   ;;  %s3581_s1 = smov 32  }
 0x3bc   :  { %2582 = dma.vmem_to_hbm [thread:$0]  %s2577_s27, 1024, %s3768_s7, [#allocation4], %s3580_s24, %s3580_s24, %s3581_s1  }
 0x3bd   :  { %3570 = dma.done.wait [#allocation4], 1024  }
 0x3be   :  { %3571 = vsyncadd [#allocation4], 4294966272 }
 0x3bf   :  { %2586 = vsyncpa [#allocation3], 1 }
 0x3c0   :  { %2587 = vsyncpa [#allocation6], 1 }
 0x3c1   :  { %2588 = vsyncpa [#allocation9], 1 }
 0x3c2   :  { %2589 = vsyncpa [#allocation4], 1 }

</bundles_post_ra>
